<compile_context>
chip_gen: v7x
topology: tpu7x:2x2x1
jax: 0.10.0
libtpu: 0.0.40
codegen_flags: <defaults>
</compile_context>

<pallas_src>
import functools

import numpy as np
import jax
import jax.numpy as jnp
from jax import lax
from jax.experimental import pallas as pl
from jax.experimental.pallas import tpu as pltpu


def _round_up(x, m):
    return ((x + m - 1) // m) * m


def _vmem_limit(needed_bytes):
    """Generation-aware VMEM limit: leave headroom below physical capacity."""
    try:
        phys = getattr(pltpu.get_tpu_info(), "vmem_capacity_bytes", None)
    except Exception:
        phys = None
    if not phys:
        phys = 128 * 1024 * 1024
    cap = int(phys * 3 // 4)                      # ~48 MiB on v7x, ~96 MiB on v5e/v6e
    return min(cap, max(32 * 1024 * 1024, int(needed_bytes) + (8 << 20)))


def _choose_chunk(T, Bp, Hp):
    """Chunk the time axis so double-buffered streamed blocks stay ~12 MiB."""
    per_step = Bp * (3 * Hp + Hp) * 2 * 2         # bf16 in+out, double-buffered
    target = min(32, max(8, (12 << 20) // max(per_step, 1)), T)
    n_chunks = -(-T // target)
    chunk = -(-T // n_chunks)
    return chunk, n_chunks


# ------------------------------------------------------------------ kernel --
def _bigru_kernel(lens_ref, xg_ref, h0_ref, wh_ref, bhn_ref,
                  out_ref, hfin_ref, h_scr, *, chunk, n_chunks):
    """One direction (grid axis 0) x one T-chunk (grid axis 1) of the GRU recurrence.

    lens_ref: (Bp, 1)  i32   sequence lengths (valid iff t < len)
    xg_ref  : (chunk, Bp, 3Hp) bf16  precomputed input projections (+folded biases)
                                     for this direction's gates, this data chunk
    h0_ref  : (Bp, Hp) f32   initial hidden for this direction
    wh_ref  : (Hp, 3Hp) bf16 fused hidden-side gate weights (resident across T)
    bhn_ref : (1, Hp)  f32   hidden-side bias of the "new" gate
    out_ref : (chunk, Bp, Hp) bf16  per-step hidden, written in TIME order
    hfin_ref: (Bp, Hp) f32   final hidden (revisited block, valid after last chunk)
    h_scr   : (2, Bp, Hp) f32 scratch carrying h across T-chunks (indexed by dir)
    """
    d = pl.program_id(0)          # 0 = fwd, 1 = bwd
    tc = pl.program_id(1)         # grid position along the (arbitrary) T-chunk axis
    Hp = h0_ref.shape[-1]

    @pl.when(tc == 0)
    def _():
        h_scr[d] = h0_ref[...]

    wh = wh_ref[...]                                           # (Hp, 3Hp) bf16
    bhn = jnp.broadcast_to(bhn_ref[...], h0_ref.shape)         # hoisted out of the loop
    lens = lens_ref[...]                                       # (Bp, 1) i32

    # data-chunk index: fwd walks chunks 0..n-1, bwd walks them from the end
    blk = (1 - d) * tc + d * (n_chunks - 1 - tc)
    t_base = blk * chunk

    def step(i, h):
        # fwd: local time i ; bwd: local time chunk-1-i (reverse within the chunk)
        tt = (1 - d) * i + d * (chunk - 1 - i)
        gx = xg_ref[tt].astype(jnp.float32)                    # (Bp, 3Hp)
        gh = jnp.dot(h.astype(jnp.bfloat16), wh,
                     preferred_element_type=jnp.float32)       # (Bp, 3Hp)
        r = jax.nn.sigmoid(gx[:, :Hp] + gh[:, :Hp])
        z = jax.nn.sigmoid(gx[:, Hp:2 * Hp] + gh[:, Hp:2 * Hp])
        n = jnp.tanh(gx[:, 2 * Hp:] + r * (gh[:, 2 * Hp:] + bhn))
        h_new = (1.0 - z) * n + z * h
        valid = (t_base + tt) < lens                           # (Bp, 1) bool
        out_ref[tt] = jnp.where(valid, h_new, 0.0).astype(out_ref.dtype)
        return jnp.where(valid, h_new, h)                      # freeze past length

    h_last = lax.fori_loop(0, chunk, step, h_scr[d], unroll=min(chunk, 8))
    h_scr[d] = h_last
    hfin_ref[...] = h_last


def _bigru_pallas(xg, lens, h0, wh, bhn, *, chunk, n_chunks):
    """xg: (T_pad, Bp, 6Hp) bf16 (cols [0:3Hp] fwd gates, [3Hp:6Hp] bwd gates)."""
    T_pad, Bp, _ = xg.shape
    Hp = h0.shape[-1]
    G = 3 * Hp

    def xg_idx(d, t):
        return ((1 - d) * t + d * (n_chunks - 1 - t), 0, d)

    def out_idx(d, t):
        return (d, (1 - d) * t + d * (n_chunks - 1 - t), 0, 0)

    needed = (2 * chunk * Bp * G * 2          # streamed xg blocks (bf16, 2-buffered)
              + 2 * chunk * Bp * Hp * 2       # streamed out blocks (bf16, 2-buffered)
              + 2 * (Hp * G * 2 + 2 * Bp * Hp * 4 + Hp * 4 + Bp * 4)  # resident small
              + 2 * Bp * Hp * 4)              # carry scratch

    kernel = functools.partial(_bigru_kernel, chunk=chunk, n_chunks=n_chunks)
    out, hfin = pl.pallas_call(
        kernel,
        out_shape=(jax.ShapeDtypeStruct((2, T_pad, Bp, Hp), jnp.bfloat16),
                   jax.ShapeDtypeStruct((2, Bp, Hp), jnp.float32)),
        grid_spec=pltpu.PrefetchScalarGridSpec(
            num_scalar_prefetch=0,
            grid=(2, n_chunks),
            in_specs=[
                pl.BlockSpec((Bp, 1), lambda d, t: (0, 0)),              # lens (resident)
                pl.BlockSpec((chunk, Bp, G), xg_idx),                    # streamed
                pl.BlockSpec((None, Bp, Hp), lambda d, t: (d, 0, 0)),    # h0 (resident)
                pl.BlockSpec((None, Hp, G), lambda d, t: (d, 0, 0)),     # wh (resident)
                pl.BlockSpec((None, 1, Hp), lambda d, t: (d, 0, 0)),     # bhn (resident)
            ],
            out_specs=[
                pl.BlockSpec((None, chunk, Bp, Hp), out_idx),            # streamed out
                pl.BlockSpec((None, Bp, Hp), lambda d, t: (d, 0, 0)),    # final hidden
            ],
            scratch_shapes=[pltpu.VMEM((2, Bp, Hp), jnp.float32)],
        ),
        compiler_params=pltpu.CompilerParams(
            dimension_semantics=("parallel", "arbitrary"),   # fwd/bwd split across TCs on v7x
            vmem_limit_bytes=_vmem_limit(needed)),
    )(lens, xg, h0, wh, bhn)
    return out, hfin


# ----------------------------------------------------- parameter preparation --
def _pad_gate_cols(w, H, Hp):
    """(rows, 3H) -> (rows, 3Hp): zero-pad each gate block's columns to Hp."""
    parts = [jnp.pad(w[:, g * H:(g + 1) * H], ((0, 0), (0, Hp - H)))
             for g in range(3)]
    return jnp.concatenate(parts, axis=1)


def _prep_dir(raw, H, Hp, first_layer):
    """Fuse per-gate weights, fold biases, pad to hardware-friendly shapes."""
    w_ih, w_hh = raw["w_ih"], raw["w_hh"]        # (3H, in), (3H, H)
    b_ih, b_hh = raw["b_ih"], raw["b_hh"]        # (3H,), (3H,)
    padH = lambda v: jnp.pad(v, (0, Hp - H))

    wh = jnp.pad(_pad_gate_cols(w_hh.T, H, Hp),
                 ((0, Hp - H), (0, 0))).astype(jnp.bfloat16)   # (Hp, 3Hp)
    bi = jnp.concatenate([padH(b_ih[:H] + b_hh[:H]),           # r: fold b_ir+b_hr
                          padH(b_ih[H:2 * H] + b_hh[H:2 * H]), # z: fold b_iz+b_hz
                          padH(b_ih[2 * H:])])                 # n: b_in only
    bhn = padH(b_hh[2 * H:])                                   # (Hp,)
    wi_t = _pad_gate_cols(w_ih.T, H, Hp)                       # (in, 3Hp) f32
    d = {"wh": wh, "bi": bi, "bhn": bhn}
    if first_layer:
        d["wi"] = wi_t
    else:
        # split input weights into fwd/bwd halves so no (T,B,2H) concat is needed
        d["wi_f"] = jnp.pad(wi_t[:H], ((0, Hp - H), (0, 0)))
        d["wi_b"] = jnp.pad(wi_t[H:], ((0, Hp - H), (0, 0)))
    return d


def prepare_encoder_params(raw):
    H = raw["hidden_size"]
    Hp = _round_up(H, 128)
    kernel_layers = []
    for l, layer in enumerate(raw["layers"]):
        f = _prep_dir(layer["fwd"], H, Hp, l == 0)
        b = _prep_dir(layer["bwd"], H, Hp, l == 0)
        stacked = {
            "wh": jnp.stack([f["wh"], b["wh"]], axis=0),                  # (2, Hp, 3Hp)
            "bhn": jnp.stack([f["bhn"], b["bhn"]], axis=0)[:, None, :],   # (2, 1, Hp)
            "bi": jnp.concatenate([f["bi"], b["bi"]], axis=0),            # (6Hp,)
        }
        if l == 0:
            stacked["wi"] = jnp.concatenate(
                [f["wi"], b["wi"]], axis=1).astype(jnp.bfloat16)          # (E, 6Hp)
        else:
            stacked["wi_f"] = jnp.concatenate(
                [f["wi_f"], b["wi_f"]], axis=1).astype(jnp.bfloat16)      # (Hp, 6Hp)
            stacked["wi_b"] = jnp.concatenate(
                [f["wi_b"], b["wi_b"]], axis=1).astype(jnp.bfloat16)      # (Hp, 6Hp)
        kernel_layers.append(stacked)
    params = dict(raw)
    params["kernel"] = kernel_layers
    params["Hp"] = Hp
    return params


# ----------------------------------------------------------------- wrapper --
def encoder_rnn_forward(params, input_seq, input_lengths, hidden=None,
                        return_state=True):
    """Mirrors EncoderRNN.forward (bidirectional multi-layer GRU, packed-seq)."""
    T, B = input_seq.shape
    H = params["hidden_size"]
    n_layers = params["n_layers"]
    Hp = params["Hp"]
    Bp = _round_up(B, 16)                      # bf16 packs 16 rows / sublane tile

    chunk, n_chunks = _choose_chunk(T, Bp, Hp)
    T_pad = chunk * n_chunks

    lengths = input_lengths.squeeze(0).astype(jnp.int32)
    lens = jnp.pad(lengths, (0, Bp - B))[:, None]              # (Bp, 1), pad rows len=0

    # embedding gather kept in plain JAX (glue)
    emb = jnp.take(params["embedding"], input_seq, axis=0)     # (T, B, E)
    emb = jnp.pad(emb, ((0, T_pad - T), (0, Bp - B), (0, 0))).astype(jnp.bfloat16)

    if hidden is None:
        hidden = jnp.zeros((2 * n_layers, B, H), jnp.float32)

    finals = []
    out_f = out_b = None
    for l in range(n_layers):
        kp = params["kernel"][l]
        # hoisted input projections: ONE big parallel bf16 matmul covers both
        # directions and all gates (cols [0:3Hp]=fwd, [3Hp:6Hp]=bwd) — no stack/reverse.
        if l == 0:
            xg = jnp.einsum("tbe,eg->tbg", emb, kp["wi"],
                            preferred_element_type=jnp.float32)
        else:
            xg = (jnp.einsum("tbh,hg->tbg", out_f, kp["wi_f"],
                             preferred_element_type=jnp.float32)
                  + jnp.einsum("tbh,hg->tbg", out_b, kp["wi_b"],
                               preferred_element_type=jnp.float32))
        xg = (xg + kp["bi"]).astype(jnp.bfloat16)              # (T_pad, Bp, 6Hp)

        h0 = jnp.stack(
            [jnp.pad(hidden[2 * l], ((0, Bp - B), (0, Hp - H))),
             jnp.pad(hidden[2 * l + 1], ((0, Bp - B), (0, Hp - H)))], axis=0)

        # TODO(synk): fuse the next layer's input projection into the T-chunk epilogue
        # (the chunk's out_fwd/out_bwd are already in VMEM) to save one HBM round trip
        # per layer for deep stacks.
        out, hfin = _bigru_pallas(xg, lens, h0, kp["wh"], kp["bhn"],
                                  chunk=chunk, n_chunks=n_chunks)
        out_f = out[0]                                         # (T_pad, Bp, Hp) bf16
        out_b = out[1]                                         # already in time order
        finals += [hfin[0, :B, :H], hfin[1, :B, :H]]

    # outputs[:, :, :H] + outputs[:, :, H:]  ==  fwd + bwd
    outputs = (out_f.astype(jnp.float32) + out_b.astype(jnp.float32))[:T, :B, :H]
    hidden_out = jnp.stack(finals, axis=0)                     # (2*n_layers, B, H)
    if return_state:
        return outputs, hidden_out
    return outputs


# --------------------------------------------------------------- reference --
def _bf16_dot(a, b):
    return jnp.dot(a.astype(jnp.bfloat16), b.astype(jnp.bfloat16),
                   preferred_element_type=jnp.float32)


def _gru_ref_dir(x, lengths, h0, raw, reverse):
    H = h0.shape[-1]
    w_ih, w_hh, b_ih, b_hh = raw["w_ih"], raw["w_hh"], raw["b_ih"], raw["b_hh"]
    wir, wiz, win = w_ih[:H].T, w_ih[H:2 * H].T, w_ih[2 * H:].T
    whr, whz, whn = w_hh[:H].T, w_hh[H:2 * H].T, w_hh[2 * H:].T
    b_r = b_ih[:H] + b_hh[:H]
    b_z = b_ih[H:2 * H] + b_hh[H:2 * H]
    b_in, b_hn = b_ih[2 * H:], b_hh[2 * H:]
    T = x.shape[0]
    h = h0
    outs = [None] * T
    order = range(T - 1, -1, -1) if reverse else range(T)
    for t in order:
        xt = x[t]
        r = jax.nn.sigmoid(_bf16_dot(xt, wir) + _bf16_dot(h, whr) + b_r)
        z = jax.nn.sigmoid(_bf16_dot(xt, wiz) + _bf16_dot(h, whz) + b_z)
        n = jnp.tanh(_bf16_dot(xt, win) + b_in + r * (_bf16_dot(h, whn) + b_hn))
        h_new = (1.0 - z) * n + z * h
        valid = (t < lengths)[:, None]
        h = jnp.where(valid, h_new, h)
        outs[t] = jnp.where(valid, h_new, 0.0)
    return jnp.stack(outs, 0), h


def encoder_rnn_reference(raw_params, input_seq, input_lengths, hidden=None):
    T, B = input_seq.shape
    H = raw_params["hidden_size"]
    n_layers = raw_params["n_layers"]
    lengths = input_lengths.squeeze(0)
    x = jnp.take(raw_params["embedding"], input_seq, axis=0)
    if hidden is None:
        hidden = jnp.zeros((2 * n_layers, B, H), jnp.float32)
    finals = []
    out_f = out_b = None
    for l in range(n_layers):
        out_f, hf = _gru_ref_dir(x, lengths, hidden[2 * l],
                                 raw_params["layers"][l]["fwd"], False)
        out_b, hb = _gru_ref_dir(x, lengths, hidden[2 * l + 1],
                                 raw_params["layers"][l]["bwd"], True)
        finals += [hf, hb]
        x = jnp.concatenate([out_f, out_b], axis=-1)
    return out_f + out_b, jnp.stack(finals, axis=0)


# ------------------------------------------------------------- init params --
def _init_dir_raw(key, input_size, hidden_size):
    k = 1.0 / np.sqrt(hidden_size)
    keys = jax.random.split(key, 4)
    return {
        "w_ih": jax.random.uniform(keys[0], (3 * hidden_size, input_size),
                                   jnp.float32, -k, k),
        "w_hh": jax.random.uniform(keys[1], (3 * hidden_size, hidden_size),
                                   jnp.float32, -k, k),
        "b_ih": jax.random.uniform(keys[2], (3 * hidden_size,), jnp.float32, -k, k),
        "b_hh": jax.random.uniform(keys[3], (3 * hidden_size,), jnp.float32, -k, k),
    }


def init_encoder_params(key, vocab_size, emb_dim, hidden_size, n_layers):
    keys = jax.random.split(key, 1 + 2 * n_layers)
    embedding = jax.random.normal(keys[0], (vocab_size, emb_dim), jnp.float32) * 0.1
    layers = []
    for l in range(n_layers):
        in_size = emb_dim if l == 0 else 2 * hidden_size
        layers.append({
            "fwd": _init_dir_raw(keys[1 + 2 * l], in_size, hidden_size),
            "bwd": _init_dir_raw(keys[2 + 2 * l], in_size, hidden_size),
        })
    return {"embedding": embedding, "layers": layers,
            "hidden_size": hidden_size, "n_layers": n_layers}


# -------------------------------------------------------------------- main --
if __name__ == "__main__":
    key = jax.random.PRNGKey(0)
    vocab_size, emb_dim, hidden_size, n_layers = 20, 32, 32, 2
    T, B = 8, 4

    k_param, k_tok = jax.random.split(key)
    raw_params = init_encoder_params(k_param, vocab_size, emb_dim,
                                     hidden_size, n_layers)
    params = prepare_encoder_params(raw_params)

    input_seq = jax.random.randint(k_tok, (T, B), 0, vocab_size, jnp.int32)
    # (1, B), sorted descending (enforce_sorted=True in the PyTorch module)
    input_lengths = jnp.array([[8, 6, 5, 3]], dtype=jnp.int32)

    outputs, hidden = encoder_rnn_forward(params, input_seq, input_lengths,
                                          hidden=None, return_state=True)
    outputs = jax.block_until_ready(outputs)
    hidden = jax.block_until_ready(hidden)

    # sanity check vs. a pure-JAX reference (bf16 matmuls, f32 accumulation)
    ref_out, ref_hid = encoder_rnn_reference(raw_params, input_seq, input_lengths)
    np.testing.assert_allclose(np.asarray(outputs), np.asarray(ref_out),
                               rtol=2e-2, atol=2e-2)
    np.testing.assert_allclose(np.asarray(hidden), np.asarray(ref_hid),
                               rtol=2e-2, atol=2e-2)

    assert outputs.shape == (T, B, hidden_size)
    assert hidden.shape == (2 * n_layers, B, hidden_size)
    print("KERNEL_OK")
</pallas_src>

<mosaic_0001>
module attributes {stable_mosaic.version = 11 : i64} {
  func.func @_bigru_kernel(%arg0: i32, %arg1: i32, %arg2: memref<16x1xi32, #tpu.memory_space<vmem>>, %arg3: memref<8x16x384xbf16, #tpu.memory_space<vmem>>, %arg4: memref<1x16x128xf32, #tpu.memory_space<vmem>>, %arg5: memref<1x128x384xbf16, #tpu.memory_space<vmem>>, %arg6: memref<1x1x128xf32, #tpu.memory_space<vmem>>, %arg7: memref<1x8x16x128xbf16, #tpu.memory_space<vmem>>, %arg8: memref<1x16x128xf32, #tpu.memory_space<vmem>>, %arg9: memref<2x16x128xf32, #tpu.memory_space<vmem>>) attributes {dimension_semantics = [#tpu.dimension_semantics<parallel>, #tpu.dimension_semantics<arbitrary>], iteration_bounds = array<i64: 2, 1>, scalar_prefetch = 0 : i64, scratch_operands = 1 : i64, tpu.core_type = #tpu.core_type<tc>, window_params = [{pipeline_mode = #tpu.pipeline_mode<synchronous>, transform_indices = @transform_0, window_bounds = array<i64: 16, 1>}, {transform_indices = @transform_1, window_bounds = array<i64: 8, 16, 384>}, {transform_indices = @transform_2, window_bounds = array<i64: 1, 16, 128>}, {transform_indices = @transform_3, window_bounds = array<i64: 1, 128, 384>}, {transform_indices = @transform_4, window_bounds = array<i64: 1, 1, 128>}, {transform_indices = @transform_5, window_bounds = array<i64: 1, 8, 16, 128>}, {transform_indices = @transform_6, window_bounds = array<i64: 1, 16, 128>}]} {
    %c0_i32 = arith.constant 0 : i32
    %0 = arith.cmpi eq, %arg1, %c0_i32 : i32
    %1 = arith.extui %0 : i1 to i32
    %c0_i32_0 = arith.constant 0 : i32
    %2 = arith.cmpi ne, %1, %c0_i32_0 : i32
    scf.if %2 {
      %c0_114 = arith.constant 0 : index
      %c0_115 = arith.constant 0 : index
      %c0_116 = arith.constant 0 : index
      %450 = vector.load %arg4[%c0_114, %c0_115, %c0_116] : memref<1x16x128xf32, #tpu.memory_space<vmem>>, vector<1x16x128xf32>
      %451 = vector.shape_cast %450 : vector<1x16x128xf32> to vector<16x128xf32>
      %452 = arith.index_cast %arg0 : i32 to index
      %c0_117 = arith.constant 0 : index
      %c0_118 = arith.constant 0 : index
      %453 = vector.load %arg9[%452, %c0_117, %c0_118] : memref<2x16x128xf32, #tpu.memory_space<vmem>>, vector<1x16x128xf32>
      %454 = vector.shape_cast %453 : vector<1x16x128xf32> to vector<16x128xf32>
      %455 = vector.shape_cast %451 : vector<16x128xf32> to vector<1x16x128xf32>
      tpu.vector_store %arg9[%452, %c0_117, %c0_118], %455 {strides = array<i32>} : memref<2x16x128xf32, #tpu.memory_space<vmem>>, vector<1x16x128xf32>,
    } else {
    }
    %c0 = arith.constant 0 : index
    %c0_1 = arith.constant 0 : index
    %c0_2 = arith.constant 0 : index
    %3 = vector.load %arg5[%c0, %c0_1, %c0_2] : memref<1x128x384xbf16, #tpu.memory_space<vmem>>, vector<1x128x384xbf16>
    %4 = vector.shape_cast %3 : vector<1x128x384xbf16> to vector<128x384xbf16>
    %c0_3 = arith.constant 0 : index
    %c0_4 = arith.constant 0 : index
    %c0_5 = arith.constant 0 : index
    %5 = vector.load %arg6[%c0_3, %c0_4, %c0_5] : memref<1x1x128xf32, #tpu.memory_space<vmem>>, vector<1x1x128xf32>
    %6 = vector.shape_cast %5 : vector<1x1x128xf32> to vector<1x128xf32>
    %7 = vector.shape_cast %6 : vector<1x128xf32> to vector<1x128xf32>
    %8 = vector.broadcast %7 : vector<1x128xf32> to vector<16x128xf32>
    %c0_6 = arith.constant 0 : index
    %c0_7 = arith.constant 0 : index
    %9 = vector.load %arg2[%c0_6, %c0_7] : memref<16x1xi32, #tpu.memory_space<vmem>>, vector<16x1xi32>
    %c1_i32 = arith.constant 1 : i32
    %10 = arith.subi %c1_i32, %arg0 : i32
    %11 = arith.muli %10, %arg1 : i32
    %c0_i32_8 = arith.constant 0 : i32
    %12 = arith.subi %c0_i32_8, %arg1 : i32
    %13 = arith.muli %arg0, %12 : i32
    %14 = arith.addi %11, %13 : i32
    %c8_i32 = arith.constant 8 : i32
    %15 = arith.muli %14, %c8_i32 : i32
    %16 = arith.index_cast %arg0 : i32 to index
    %c0_9 = arith.constant 0 : index
    %c0_10 = arith.constant 0 : index
    %17 = vector.load %arg9[%16, %c0_9, %c0_10] : memref<2x16x128xf32, #tpu.memory_space<vmem>>, vector<1x16x128xf32>
    %18 = vector.shape_cast %17 : vector<1x16x128xf32> to vector<16x128xf32>
    %c0_i32_11 = arith.constant 0 : i32
    %c1_i32_12 = arith.constant 1 : i32
    %19 = arith.subi %c1_i32_12, %arg0 : i32
    %20 = arith.muli %19, %c0_i32_11 : i32
    %c7_i32 = arith.constant 7 : i32
    %21 = arith.subi %c7_i32, %c0_i32_11 : i32
    %22 = arith.muli %arg0, %21 : i32
    %23 = arith.addi %20, %22 : i32
    %24 = arith.index_cast %23 : i32 to index
    %c0_13 = arith.constant 0 : index
    %c0_14 = arith.constant 0 : index
    %25 = vector.load %arg3[%24, %c0_13, %c0_14] : memref<8x16x384xbf16, #tpu.memory_space<vmem>>, vector<1x16x384xbf16>
    %26 = vector.shape_cast %25 : vector<1x16x384xbf16> to vector<16x384xbf16>
    %27 = arith.extf %26 : vector<16x384xbf16> to vector<16x384xf32>
    %28 = arith.truncf %18 : vector<16x128xf32> to vector<16x128xbf16>
    %cst = arith.constant dense<0.000000e+00> : vector<16x384xf32>
    %29 = tpu.matmul %28, %4, %cst {dimension_numbers = #tpu.dot_dimension_numbers<[1], [0], [0], [1], [0, 0, 1, 1], [], []>} : vector<16x128xbf16>, vector<128x384xbf16>, vector<16x384xf32> -> vector<16x384xf32>
    %30 = vector.extract_strided_slice %27 {offsets = [0, 0], sizes = [16, 128], strides = [1, 1]} : vector<16x384xf32> to vector<16x128xf32>
    %31 = vector.extract_strided_slice %29 {offsets = [0, 0], sizes = [16, 128], strides = [1, 1]} : vector<16x384xf32> to vector<16x128xf32>
    %32 = arith.addf %30, %31 : vector<16x128xf32>
    %33 = arith.negf %32 : vector<16x128xf32>
    %34 = math.exp %33 : vector<16x128xf32>
    %cst_15 = arith.constant 1.000000e+00 : f32
    %35 = vector.broadcast %cst_15 : f32 to vector<16x128xf32>
    %36 = arith.addf %35, %34 : vector<16x128xf32>
    %37 = arith.divf %35, %36 : vector<16x128xf32>
    %38 = vector.extract_strided_slice %27 {offsets = [0, 128], sizes = [16, 128], strides = [1, 1]} : vector<16x384xf32> to vector<16x128xf32>
    %39 = vector.extract_strided_slice %29 {offsets = [0, 128], sizes = [16, 128], strides = [1, 1]} : vector<16x384xf32> to vector<16x128xf32>
    %40 = arith.addf %38, %39 : vector<16x128xf32>
    %41 = arith.negf %40 : vector<16x128xf32>
    %42 = math.exp %41 : vector<16x128xf32>
    %cst_16 = arith.constant 1.000000e+00 : f32
    %43 = vector.broadcast %cst_16 : f32 to vector<16x128xf32>
    %44 = arith.addf %43, %42 : vector<16x128xf32>
    %45 = arith.divf %43, %44 : vector<16x128xf32>
    %46 = vector.extract_strided_slice %27 {offsets = [0, 256], sizes = [16, 128], strides = [1, 1]} : vector<16x384xf32> to vector<16x128xf32>
    %47 = vector.extract_strided_slice %29 {offsets = [0, 256], sizes = [16, 128], strides = [1, 1]} : vector<16x384xf32> to vector<16x128xf32>
    %48 = arith.addf %47, %8 : vector<16x128xf32>
    %49 = arith.mulf %37, %48 : vector<16x128xf32>
    %50 = arith.addf %46, %49 : vector<16x128xf32>
    %51 = math.tanh %50 : vector<16x128xf32>
    %cst_17 = arith.constant 1.000000e+00 : f32
    %52 = vector.broadcast %cst_17 : f32 to vector<16x128xf32>
    %53 = arith.subf %52, %45 : vector<16x128xf32>
    %54 = arith.mulf %53, %51 : vector<16x128xf32>
    %55 = arith.mulf %45, %18 : vector<16x128xf32>
    %56 = arith.addf %54, %55 : vector<16x128xf32>
    %57 = arith.addi %15, %23 : i32
    %58 = vector.broadcast %57 : i32 to vector<16x1xi32>
    %59 = arith.cmpi slt, %58, %9 : vector<16x1xi32>
    %cst_18 = arith.constant 0.000000e+00 : f32
    %60 = vector.shape_cast %59 : vector<16x1xi1> to vector<16x1xi1>
    %61 = vector.broadcast %60 : vector<16x1xi1> to vector<16x128xi1>
    %62 = vector.broadcast %cst_18 : f32 to vector<16x128xf32>
    %63 = arith.select %61, %56, %62 : vector<16x128xi1>, vector<16x128xf32>
    %64 = arith.truncf %63 : vector<16x128xf32> to vector<16x128xbf16>
    %c0_19 = arith.constant 0 : index
    %65 = arith.index_cast %23 : i32 to index
    %c0_20 = arith.constant 0 : index
    %c0_21 = arith.constant 0 : index
    %66 = vector.load %arg7[%c0_19, %65, %c0_20, %c0_21] : memref<1x8x16x128xbf16, #tpu.memory_space<vmem>>, vector<1x1x16x128xbf16>
    %67 = vector.shape_cast %66 : vector<1x1x16x128xbf16> to vector<16x128xbf16>
    %68 = vector.shape_cast %64 : vector<16x128xbf16> to vector<1x1x16x128xbf16>
    tpu.vector_store %arg7[%c0_19, %65, %c0_20, %c0_21], %68 {strides = array<i32>} : memref<1x8x16x128xbf16, #tpu.memory_space<vmem>>, vector<1x1x16x128xbf16>,
    %69 = vector.shape_cast %59 : vector<16x1xi1> to vector<16x1xi1>
    %70 = vector.broadcast %69 : vector<16x1xi1> to vector<16x128xi1>
    %71 = arith.select %70, %56, %18 : vector<16x128xi1>, vector<16x128xf32>
    %c1_i32_22 = arith.constant 1 : i32
    %c1_i32_23 = arith.constant 1 : i32
    %72 = arith.subi %c1_i32_23, %arg0 : i32
    %73 = arith.muli %72, %c1_i32_22 : i32
    %c7_i32_24 = arith.constant 7 : i32
    %74 = arith.subi %c7_i32_24, %c1_i32_22 : i32
    %75 = arith.muli %arg0, %74 : i32
    %76 = arith.addi %73, %75 : i32
    %77 = arith.index_cast %76 : i32 to index
    %c0_25 = arith.constant 0 : index
    %c0_26 = arith.constant 0 : index
    %78 = vector.load %arg3[%77, %c0_25, %c0_26] : memref<8x16x384xbf16, #tpu.memory_space<vmem>>, vector<1x16x384xbf16>
    %79 = vector.shape_cast %78 : vector<1x16x384xbf16> to vector<16x384xbf16>
    %80 = arith.extf %79 : vector<16x384xbf16> to vector<16x384xf32>
    %81 = arith.truncf %71 : vector<16x128xf32> to vector<16x128xbf16>
    %cst_27 = arith.constant dense<0.000000e+00> : vector<16x384xf32>
    %82 = tpu.matmul %81, %4, %cst_27 {dimension_numbers = #tpu.dot_dimension_numbers<[1], [0], [0], [1], [0, 0, 1, 1], [], []>} : vector<16x128xbf16>, vector<128x384xbf16>, vector<16x384xf32> -> vector<16x384xf32>
    %83 = vector.extract_strided_slice %80 {offsets = [0, 0], sizes = [16, 128], strides = [1, 1]} : vector<16x384xf32> to vector<16x128xf32>
    %84 = vector.extract_strided_slice %82 {offsets = [0, 0], sizes = [16, 128], strides = [1, 1]} : vector<16x384xf32> to vector<16x128xf32>
    %85 = arith.addf %83, %84 : vector<16x128xf32>
    %86 = arith.negf %85 : vector<16x128xf32>
    %87 = math.exp %86 : vector<16x128xf32>
    %cst_28 = arith.constant 1.000000e+00 : f32
    %88 = vector.broadcast %cst_28 : f32 to vector<16x128xf32>
    %89 = arith.addf %88, %87 : vector<16x128xf32>
    %90 = arith.divf %88, %89 : vector<16x128xf32>
    %91 = vector.extract_strided_slice %80 {offsets = [0, 128], sizes = [16, 128], strides = [1, 1]} : vector<16x384xf32> to vector<16x128xf32>
    %92 = vector.extract_strided_slice %82 {offsets = [0, 128], sizes = [16, 128], strides = [1, 1]} : vector<16x384xf32> to vector<16x128xf32>
    %93 = arith.addf %91, %92 : vector<16x128xf32>
    %94 = arith.negf %93 : vector<16x128xf32>
    %95 = math.exp %94 : vector<16x128xf32>
    %cst_29 = arith.constant 1.000000e+00 : f32
    %96 = vector.broadcast %cst_29 : f32 to vector<16x128xf32>
    %97 = arith.addf %96, %95 : vector<16x128xf32>
    %98 = arith.divf %96, %97 : vector<16x128xf32>
    %99 = vector.extract_strided_slice %80 {offsets = [0, 256], sizes = [16, 128], strides = [1, 1]} : vector<16x384xf32> to vector<16x128xf32>
    %100 = vector.extract_strided_slice %82 {offsets = [0, 256], sizes = [16, 128], strides = [1, 1]} : vector<16x384xf32> to vector<16x128xf32>
    %101 = arith.addf %100, %8 : vector<16x128xf32>
    %102 = arith.mulf %90, %101 : vector<16x128xf32>
    %103 = arith.addf %99, %102 : vector<16x128xf32>
    %104 = math.tanh %103 : vector<16x128xf32>
    %cst_30 = arith.constant 1.000000e+00 : f32
    %105 = vector.broadcast %cst_30 : f32 to vector<16x128xf32>
    %106 = arith.subf %105, %98 : vector<16x128xf32>
    %107 = arith.mulf %106, %104 : vector<16x128xf32>
    %108 = arith.mulf %98, %71 : vector<16x128xf32>
    %109 = arith.addf %107, %108 : vector<16x128xf32>
    %110 = arith.addi %15, %76 : i32
    %111 = vector.broadcast %110 : i32 to vector<16x1xi32>
    %112 = arith.cmpi slt, %111, %9 : vector<16x1xi32>
    %cst_31 = arith.constant 0.000000e+00 : f32
    %113 = vector.shape_cast %112 : vector<16x1xi1> to vector<16x1xi1>
    %114 = vector.broadcast %113 : vector<16x1xi1> to vector<16x128xi1>
    %115 = vector.broadcast %cst_31 : f32 to vector<16x128xf32>
    %116 = arith.select %114, %109, %115 : vector<16x128xi1>, vector<16x128xf32>
    %117 = arith.truncf %116 : vector<16x128xf32> to vector<16x128xbf16>
    %c0_32 = arith.constant 0 : index
    %118 = arith.index_cast %76 : i32 to index
    %c0_33 = arith.constant 0 : index
    %c0_34 = arith.constant 0 : index
    %119 = vector.load %arg7[%c0_32, %118, %c0_33, %c0_34] : memref<1x8x16x128xbf16, #tpu.memory_space<vmem>>, vector<1x1x16x128xbf16>
    %120 = vector.shape_cast %119 : vector<1x1x16x128xbf16> to vector<16x128xbf16>
    %121 = vector.shape_cast %117 : vector<16x128xbf16> to vector<1x1x16x128xbf16>
    tpu.vector_store %arg7[%c0_32, %118, %c0_33, %c0_34], %121 {strides = array<i32>} : memref<1x8x16x128xbf16, #tpu.memory_space<vmem>>, vector<1x1x16x128xbf16>,
    %122 = vector.shape_cast %112 : vector<16x1xi1> to vector<16x1xi1>
    %123 = vector.broadcast %122 : vector<16x1xi1> to vector<16x128xi1>
    %124 = arith.select %123, %109, %71 : vector<16x128xi1>, vector<16x128xf32>
    %c2_i32 = arith.constant 2 : i32
    %c1_i32_35 = arith.constant 1 : i32
    %125 = arith.subi %c1_i32_35, %arg0 : i32
    %126 = arith.muli %125, %c2_i32 : i32
    %c7_i32_36 = arith.constant 7 : i32
    %127 = arith.subi %c7_i32_36, %c2_i32 : i32
    %128 = arith.muli %arg0, %127 : i32
    %129 = arith.addi %126, %128 : i32
    %130 = arith.index_cast %129 : i32 to index
    %c0_37 = arith.constant 0 : index
    %c0_38 = arith.constant 0 : index
    %131 = vector.load %arg3[%130, %c0_37, %c0_38] : memref<8x16x384xbf16, #tpu.memory_space<vmem>>, vector<1x16x384xbf16>
    %132 = vector.shape_cast %131 : vector<1x16x384xbf16> to vector<16x384xbf16>
    %133 = arith.extf %132 : vector<16x384xbf16> to vector<16x384xf32>
    %134 = arith.truncf %124 : vector<16x128xf32> to vector<16x128xbf16>
    %cst_39 = arith.constant dense<0.000000e+00> : vector<16x384xf32>
    %135 = tpu.matmul %134, %4, %cst_39 {dimension_numbers = #tpu.dot_dimension_numbers<[1], [0], [0], [1], [0, 0, 1, 1], [], []>} : vector<16x128xbf16>, vector<128x384xbf16>, vector<16x384xf32> -> vector<16x384xf32>
    %136 = vector.extract_strided_slice %133 {offsets = [0, 0], sizes = [16, 128], strides = [1, 1]} : vector<16x384xf32> to vector<16x128xf32>
    %137 = vector.extract_strided_slice %135 {offsets = [0, 0], sizes = [16, 128], strides = [1, 1]} : vector<16x384xf32> to vector<16x128xf32>
    %138 = arith.addf %136, %137 : vector<16x128xf32>
    %139 = arith.negf %138 : vector<16x128xf32>
    %140 = math.exp %139 : vector<16x128xf32>
    %cst_40 = arith.constant 1.000000e+00 : f32
    %141 = vector.broadcast %cst_40 : f32 to vector<16x128xf32>
    %142 = arith.addf %141, %140 : vector<16x128xf32>
    %143 = arith.divf %141, %142 : vector<16x128xf32>
    %144 = vector.extract_strided_slice %133 {offsets = [0, 128], sizes = [16, 128], strides = [1, 1]} : vector<16x384xf32> to vector<16x128xf32>
    %145 = vector.extract_strided_slice %135 {offsets = [0, 128], sizes = [16, 128], strides = [1, 1]} : vector<16x384xf32> to vector<16x128xf32>
    %146 = arith.addf %144, %145 : vector<16x128xf32>
    %147 = arith.negf %146 : vector<16x128xf32>
    %148 = math.exp %147 : vector<16x128xf32>
    %cst_41 = arith.constant 1.000000e+00 : f32
    %149 = vector.broadcast %cst_41 : f32 to vector<16x128xf32>
    %150 = arith.addf %149, %148 : vector<16x128xf32>
    %151 = arith.divf %149, %150 : vector<16x128xf32>
    %152 = vector.extract_strided_slice %133 {offsets = [0, 256], sizes = [16, 128], strides = [1, 1]} : vector<16x384xf32> to vector<16x128xf32>
    %153 = vector.extract_strided_slice %135 {offsets = [0, 256], sizes = [16, 128], strides = [1, 1]} : vector<16x384xf32> to vector<16x128xf32>
    %154 = arith.addf %153, %8 : vector<16x128xf32>
    %155 = arith.mulf %143, %154 : vector<16x128xf32>
    %156 = arith.addf %152, %155 : vector<16x128xf32>
    %157 = math.tanh %156 : vector<16x128xf32>
    %cst_42 = arith.constant 1.000000e+00 : f32
    %158 = vector.broadcast %cst_42 : f32 to vector<16x128xf32>
    %159 = arith.subf %158, %151 : vector<16x128xf32>
    %160 = arith.mulf %159, %157 : vector<16x128xf32>
    %161 = arith.mulf %151, %124 : vector<16x128xf32>
    %162 = arith.addf %160, %161 : vector<16x128xf32>
    %163 = arith.addi %15, %129 : i32
    %164 = vector.broadcast %163 : i32 to vector<16x1xi32>
    %165 = arith.cmpi slt, %164, %9 : vector<16x1xi32>
    %cst_43 = arith.constant 0.000000e+00 : f32
    %166 = vector.shape_cast %165 : vector<16x1xi1> to vector<16x1xi1>
    %167 = vector.broadcast %166 : vector<16x1xi1> to vector<16x128xi1>
    %168 = vector.broadcast %cst_43 : f32 to vector<16x128xf32>
    %169 = arith.select %167, %162, %168 : vector<16x128xi1>, vector<16x128xf32>
    %170 = arith.truncf %169 : vector<16x128xf32> to vector<16x128xbf16>
    %c0_44 = arith.constant 0 : index
    %171 = arith.index_cast %129 : i32 to index
    %c0_45 = arith.constant 0 : index
    %c0_46 = arith.constant 0 : index
    %172 = vector.load %arg7[%c0_44, %171, %c0_45, %c0_46] : memref<1x8x16x128xbf16, #tpu.memory_space<vmem>>, vector<1x1x16x128xbf16>
    %173 = vector.shape_cast %172 : vector<1x1x16x128xbf16> to vector<16x128xbf16>
    %174 = vector.shape_cast %170 : vector<16x128xbf16> to vector<1x1x16x128xbf16>
    tpu.vector_store %arg7[%c0_44, %171, %c0_45, %c0_46], %174 {strides = array<i32>} : memref<1x8x16x128xbf16, #tpu.memory_space<vmem>>, vector<1x1x16x128xbf16>,
    %175 = vector.shape_cast %165 : vector<16x1xi1> to vector<16x1xi1>
    %176 = vector.broadcast %175 : vector<16x1xi1> to vector<16x128xi1>
    %177 = arith.select %176, %162, %124 : vector<16x128xi1>, vector<16x128xf32>
    %c3_i32 = arith.constant 3 : i32
    %c1_i32_47 = arith.constant 1 : i32
    %178 = arith.subi %c1_i32_47, %arg0 : i32
    %179 = arith.muli %178, %c3_i32 : i32
    %c7_i32_48 = arith.constant 7 : i32
    %180 = arith.subi %c7_i32_48, %c3_i32 : i32
    %181 = arith.muli %arg0, %180 : i32
    %182 = arith.addi %179, %181 : i32
    %183 = arith.index_cast %182 : i32 to index
    %c0_49 = arith.constant 0 : index
    %c0_50 = arith.constant 0 : index
    %184 = vector.load %arg3[%183, %c0_49, %c0_50] : memref<8x16x384xbf16, #tpu.memory_space<vmem>>, vector<1x16x384xbf16>
    %185 = vector.shape_cast %184 : vector<1x16x384xbf16> to vector<16x384xbf16>
    %186 = arith.extf %185 : vector<16x384xbf16> to vector<16x384xf32>
    %187 = arith.truncf %177 : vector<16x128xf32> to vector<16x128xbf16>
    %cst_51 = arith.constant dense<0.000000e+00> : vector<16x384xf32>
    %188 = tpu.matmul %187, %4, %cst_51 {dimension_numbers = #tpu.dot_dimension_numbers<[1], [0], [0], [1], [0, 0, 1, 1], [], []>} : vector<16x128xbf16>, vector<128x384xbf16>, vector<16x384xf32> -> vector<16x384xf32>
    %189 = vector.extract_strided_slice %186 {offsets = [0, 0], sizes = [16, 128], strides = [1, 1]} : vector<16x384xf32> to vector<16x128xf32>
    %190 = vector.extract_strided_slice %188 {offsets = [0, 0], sizes = [16, 128], strides = [1, 1]} : vector<16x384xf32> to vector<16x128xf32>
    %191 = arith.addf %189, %190 : vector<16x128xf32>
    %192 = arith.negf %191 : vector<16x128xf32>
    %193 = math.exp %192 : vector<16x128xf32>
    %cst_52 = arith.constant 1.000000e+00 : f32
    %194 = vector.broadcast %cst_52 : f32 to vector<16x128xf32>
    %195 = arith.addf %194, %193 : vector<16x128xf32>
    %196 = arith.divf %194, %195 : vector<16x128xf32>
    %197 = vector.extract_strided_slice %186 {offsets = [0, 128], sizes = [16, 128], strides = [1, 1]} : vector<16x384xf32> to vector<16x128xf32>
    %198 = vector.extract_strided_slice %188 {offsets = [0, 128], sizes = [16, 128], strides = [1, 1]} : vector<16x384xf32> to vector<16x128xf32>
    %199 = arith.addf %197, %198 : vector<16x128xf32>
    %200 = arith.negf %199 : vector<16x128xf32>
    %201 = math.exp %200 : vector<16x128xf32>
    %cst_53 = arith.constant 1.000000e+00 : f32
    %202 = vector.broadcast %cst_53 : f32 to vector<16x128xf32>
    %203 = arith.addf %202, %201 : vector<16x128xf32>
    %204 = arith.divf %202, %203 : vector<16x128xf32>
    %205 = vector.extract_strided_slice %186 {offsets = [0, 256], sizes = [16, 128], strides = [1, 1]} : vector<16x384xf32> to vector<16x128xf32>
    %206 = vector.extract_strided_slice %188 {offsets = [0, 256], sizes = [16, 128], strides = [1, 1]} : vector<16x384xf32> to vector<16x128xf32>
    %207 = arith.addf %206, %8 : vector<16x128xf32>
    %208 = arith.mulf %196, %207 : vector<16x128xf32>
    %209 = arith.addf %205, %208 : vector<16x128xf32>
    %210 = math.tanh %209 : vector<16x128xf32>
    %cst_54 = arith.constant 1.000000e+00 : f32
    %211 = vector.broadcast %cst_54 : f32 to vector<16x128xf32>
    %212 = arith.subf %211, %204 : vector<16x128xf32>
    %213 = arith.mulf %212, %210 : vector<16x128xf32>
    %214 = arith.mulf %204, %177 : vector<16x128xf32>
    %215 = arith.addf %213, %214 : vector<16x128xf32>
    %216 = arith.addi %15, %182 : i32
    %217 = vector.broadcast %216 : i32 to vector<16x1xi32>
    %218 = arith.cmpi slt, %217, %9 : vector<16x1xi32>
    %cst_55 = arith.constant 0.000000e+00 : f32
    %219 = vector.shape_cast %218 : vector<16x1xi1> to vector<16x1xi1>
    %220 = vector.broadcast %219 : vector<16x1xi1> to vector<16x128xi1>
    %221 = vector.broadcast %cst_55 : f32 to vector<16x128xf32>
    %222 = arith.select %220, %215, %221 : vector<16x128xi1>, vector<16x128xf32>
    %223 = arith.truncf %222 : vector<16x128xf32> to vector<16x128xbf16>
    %c0_56 = arith.constant 0 : index
    %224 = arith.index_cast %182 : i32 to index
    %c0_57 = arith.constant 0 : index
    %c0_58 = arith.constant 0 : index
    %225 = vector.load %arg7[%c0_56, %224, %c0_57, %c0_58] : memref<1x8x16x128xbf16, #tpu.memory_space<vmem>>, vector<1x1x16x128xbf16>
    %226 = vector.shape_cast %225 : vector<1x1x16x128xbf16> to vector<16x128xbf16>
    %227 = vector.shape_cast %223 : vector<16x128xbf16> to vector<1x1x16x128xbf16>
    tpu.vector_store %arg7[%c0_56, %224, %c0_57, %c0_58], %227 {strides = array<i32>} : memref<1x8x16x128xbf16, #tpu.memory_space<vmem>>, vector<1x1x16x128xbf16>,
    %228 = vector.shape_cast %218 : vector<16x1xi1> to vector<16x1xi1>
    %229 = vector.broadcast %228 : vector<16x1xi1> to vector<16x128xi1>
    %230 = arith.select %229, %215, %177 : vector<16x128xi1>, vector<16x128xf32>
    %c4_i32 = arith.constant 4 : i32
    %c1_i32_59 = arith.constant 1 : i32
    %231 = arith.subi %c1_i32_59, %arg0 : i32
    %232 = arith.muli %231, %c4_i32 : i32
    %c7_i32_60 = arith.constant 7 : i32
    %233 = arith.subi %c7_i32_60, %c4_i32 : i32
    %234 = arith.muli %arg0, %233 : i32
    %235 = arith.addi %232, %234 : i32
    %236 = arith.index_cast %235 : i32 to index
    %c0_61 = arith.constant 0 : index
    %c0_62 = arith.constant 0 : index
    %237 = vector.load %arg3[%236, %c0_61, %c0_62] : memref<8x16x384xbf16, #tpu.memory_space<vmem>>, vector<1x16x384xbf16>
    %238 = vector.shape_cast %237 : vector<1x16x384xbf16> to vector<16x384xbf16>
    %239 = arith.extf %238 : vector<16x384xbf16> to vector<16x384xf32>
    %240 = arith.truncf %230 : vector<16x128xf32> to vector<16x128xbf16>
    %cst_63 = arith.constant dense<0.000000e+00> : vector<16x384xf32>
    %241 = tpu.matmul %240, %4, %cst_63 {dimension_numbers = #tpu.dot_dimension_numbers<[1], [0], [0], [1], [0, 0, 1, 1], [], []>} : vector<16x128xbf16>, vector<128x384xbf16>, vector<16x384xf32> -> vector<16x384xf32>
    %242 = vector.extract_strided_slice %239 {offsets = [0, 0], sizes = [16, 128], strides = [1, 1]} : vector<16x384xf32> to vector<16x128xf32>
    %243 = vector.extract_strided_slice %241 {offsets = [0, 0], sizes = [16, 128], strides = [1, 1]} : vector<16x384xf32> to vector<16x128xf32>
    %244 = arith.addf %242, %243 : vector<16x128xf32>
    %245 = arith.negf %244 : vector<16x128xf32>
    %246 = math.exp %245 : vector<16x128xf32>
    %cst_64 = arith.constant 1.000000e+00 : f32
    %247 = vector.broadcast %cst_64 : f32 to vector<16x128xf32>
    %248 = arith.addf %247, %246 : vector<16x128xf32>
    %249 = arith.divf %247, %248 : vector<16x128xf32>
    %250 = vector.extract_strided_slice %239 {offsets = [0, 128], sizes = [16, 128], strides = [1, 1]} : vector<16x384xf32> to vector<16x128xf32>
    %251 = vector.extract_strided_slice %241 {offsets = [0, 128], sizes = [16, 128], strides = [1, 1]} : vector<16x384xf32> to vector<16x128xf32>
    %252 = arith.addf %250, %251 : vector<16x128xf32>
    %253 = arith.negf %252 : vector<16x128xf32>
    %254 = math.exp %253 : vector<16x128xf32>
    %cst_65 = arith.constant 1.000000e+00 : f32
    %255 = vector.broadcast %cst_65 : f32 to vector<16x128xf32>
    %256 = arith.addf %255, %254 : vector<16x128xf32>
    %257 = arith.divf %255, %256 : vector<16x128xf32>
    %258 = vector.extract_strided_slice %239 {offsets = [0, 256], sizes = [16, 128], strides = [1, 1]} : vector<16x384xf32> to vector<16x128xf32>
    %259 = vector.extract_strided_slice %241 {offsets = [0, 256], sizes = [16, 128], strides = [1, 1]} : vector<16x384xf32> to vector<16x128xf32>
    %260 = arith.addf %259, %8 : vector<16x128xf32>
    %261 = arith.mulf %249, %260 : vector<16x128xf32>
    %262 = arith.addf %258, %261 : vector<16x128xf32>
    %263 = math.tanh %262 : vector<16x128xf32>
    %cst_66 = arith.constant 1.000000e+00 : f32
    %264 = vector.broadcast %cst_66 : f32 to vector<16x128xf32>
    %265 = arith.subf %264, %257 : vector<16x128xf32>
    %266 = arith.mulf %265, %263 : vector<16x128xf32>
    %267 = arith.mulf %257, %230 : vector<16x128xf32>
    %268 = arith.addf %266, %267 : vector<16x128xf32>
    %269 = arith.addi %15, %235 : i32
    %270 = vector.broadcast %269 : i32 to vector<16x1xi32>
    %271 = arith.cmpi slt, %270, %9 : vector<16x1xi32>
    %cst_67 = arith.constant 0.000000e+00 : f32
    %272 = vector.shape_cast %271 : vector<16x1xi1> to vector<16x1xi1>
    %273 = vector.broadcast %272 : vector<16x1xi1> to vector<16x128xi1>
    %274 = vector.broadcast %cst_67 : f32 to vector<16x128xf32>
    %275 = arith.select %273, %268, %274 : vector<16x128xi1>, vector<16x128xf32>
    %276 = arith.truncf %275 : vector<16x128xf32> to vector<16x128xbf16>
    %c0_68 = arith.constant 0 : index
    %277 = arith.index_cast %235 : i32 to index
    %c0_69 = arith.constant 0 : index
    %c0_70 = arith.constant 0 : index
    %278 = vector.load %arg7[%c0_68, %277, %c0_69, %c0_70] : memref<1x8x16x128xbf16, #tpu.memory_space<vmem>>, vector<1x1x16x128xbf16>
    %279 = vector.shape_cast %278 : vector<1x1x16x128xbf16> to vector<16x128xbf16>
    %280 = vector.shape_cast %276 : vector<16x128xbf16> to vector<1x1x16x128xbf16>
    tpu.vector_store %arg7[%c0_68, %277, %c0_69, %c0_70], %280 {strides = array<i32>} : memref<1x8x16x128xbf16, #tpu.memory_space<vmem>>, vector<1x1x16x128xbf16>,
    %281 = vector.shape_cast %271 : vector<16x1xi1> to vector<16x1xi1>
    %282 = vector.broadcast %281 : vector<16x1xi1> to vector<16x128xi1>
    %283 = arith.select %282, %268, %230 : vector<16x128xi1>, vector<16x128xf32>
    %c5_i32 = arith.constant 5 : i32
    %c1_i32_71 = arith.constant 1 : i32
    %284 = arith.subi %c1_i32_71, %arg0 : i32
    %285 = arith.muli %284, %c5_i32 : i32
    %c7_i32_72 = arith.constant 7 : i32
    %286 = arith.subi %c7_i32_72, %c5_i32 : i32
    %287 = arith.muli %arg0, %286 : i32
    %288 = arith.addi %285, %287 : i32
    %289 = arith.index_cast %288 : i32 to index
    %c0_73 = arith.constant 0 : index
    %c0_74 = arith.constant 0 : index
    %290 = vector.load %arg3[%289, %c0_73, %c0_74] : memref<8x16x384xbf16, #tpu.memory_space<vmem>>, vector<1x16x384xbf16>
    %291 = vector.shape_cast %290 : vector<1x16x384xbf16> to vector<16x384xbf16>
    %292 = arith.extf %291 : vector<16x384xbf16> to vector<16x384xf32>
    %293 = arith.truncf %283 : vector<16x128xf32> to vector<16x128xbf16>
    %cst_75 = arith.constant dense<0.000000e+00> : vector<16x384xf32>
    %294 = tpu.matmul %293, %4, %cst_75 {dimension_numbers = #tpu.dot_dimension_numbers<[1], [0], [0], [1], [0, 0, 1, 1], [], []>} : vector<16x128xbf16>, vector<128x384xbf16>, vector<16x384xf32> -> vector<16x384xf32>
    %295 = vector.extract_strided_slice %292 {offsets = [0, 0], sizes = [16, 128], strides = [1, 1]} : vector<16x384xf32> to vector<16x128xf32>
    %296 = vector.extract_strided_slice %294 {offsets = [0, 0], sizes = [16, 128], strides = [1, 1]} : vector<16x384xf32> to vector<16x128xf32>
    %297 = arith.addf %295, %296 : vector<16x128xf32>
    %298 = arith.negf %297 : vector<16x128xf32>
    %299 = math.exp %298 : vector<16x128xf32>
    %cst_76 = arith.constant 1.000000e+00 : f32
    %300 = vector.broadcast %cst_76 : f32 to vector<16x128xf32>
    %301 = arith.addf %300, %299 : vector<16x128xf32>
    %302 = arith.divf %300, %301 : vector<16x128xf32>
    %303 = vector.extract_strided_slice %292 {offsets = [0, 128], sizes = [16, 128], strides = [1, 1]} : vector<16x384xf32> to vector<16x128xf32>
    %304 = vector.extract_strided_slice %294 {offsets = [0, 128], sizes = [16, 128], strides = [1, 1]} : vector<16x384xf32> to vector<16x128xf32>
    %305 = arith.addf %303, %304 : vector<16x128xf32>
    %306 = arith.negf %305 : vector<16x128xf32>
    %307 = math.exp %306 : vector<16x128xf32>
    %cst_77 = arith.constant 1.000000e+00 : f32
    %308 = vector.broadcast %cst_77 : f32 to vector<16x128xf32>
    %309 = arith.addf %308, %307 : vector<16x128xf32>
    %310 = arith.divf %308, %309 : vector<16x128xf32>
    %311 = vector.extract_strided_slice %292 {offsets = [0, 256], sizes = [16, 128], strides = [1, 1]} : vector<16x384xf32> to vector<16x128xf32>
    %312 = vector.extract_strided_slice %294 {offsets = [0, 256], sizes = [16, 128], strides = [1, 1]} : vector<16x384xf32> to vector<16x128xf32>
    %313 = arith.addf %312, %8 : vector<16x128xf32>
    %314 = arith.mulf %302, %313 : vector<16x128xf32>
    %315 = arith.addf %311, %314 : vector<16x128xf32>
    %316 = math.tanh %315 : vector<16x128xf32>
    %cst_78 = arith.constant 1.000000e+00 : f32
    %317 = vector.broadcast %cst_78 : f32 to vector<16x128xf32>
    %318 = arith.subf %317, %310 : vector<16x128xf32>
    %319 = arith.mulf %318, %316 : vector<16x128xf32>
    %320 = arith.mulf %310, %283 : vector<16x128xf32>
    %321 = arith.addf %319, %320 : vector<16x128xf32>
    %322 = arith.addi %15, %288 : i32
    %323 = vector.broadcast %322 : i32 to vector<16x1xi32>
    %324 = arith.cmpi slt, %323, %9 : vector<16x1xi32>
    %cst_79 = arith.constant 0.000000e+00 : f32
    %325 = vector.shape_cast %324 : vector<16x1xi1> to vector<16x1xi1>
    %326 = vector.broadcast %325 : vector<16x1xi1> to vector<16x128xi1>
    %327 = vector.broadcast %cst_79 : f32 to vector<16x128xf32>
    %328 = arith.select %326, %321, %327 : vector<16x128xi1>, vector<16x128xf32>
    %329 = arith.truncf %328 : vector<16x128xf32> to vector<16x128xbf16>
    %c0_80 = arith.constant 0 : index
    %330 = arith.index_cast %288 : i32 to index
    %c0_81 = arith.constant 0 : index
    %c0_82 = arith.constant 0 : index
    %331 = vector.load %arg7[%c0_80, %330, %c0_81, %c0_82] : memref<1x8x16x128xbf16, #tpu.memory_space<vmem>>, vector<1x1x16x128xbf16>
    %332 = vector.shape_cast %331 : vector<1x1x16x128xbf16> to vector<16x128xbf16>
    %333 = vector.shape_cast %329 : vector<16x128xbf16> to vector<1x1x16x128xbf16>
    tpu.vector_store %arg7[%c0_80, %330, %c0_81, %c0_82], %333 {strides = array<i32>} : memref<1x8x16x128xbf16, #tpu.memory_space<vmem>>, vector<1x1x16x128xbf16>,
    %334 = vector.shape_cast %324 : vector<16x1xi1> to vector<16x1xi1>
    %335 = vector.broadcast %334 : vector<16x1xi1> to vector<16x128xi1>
    %336 = arith.select %335, %321, %283 : vector<16x128xi1>, vector<16x128xf32>
    %c6_i32 = arith.constant 6 : i32
    %c1_i32_83 = arith.constant 1 : i32
    %337 = arith.subi %c1_i32_83, %arg0 : i32
    %338 = arith.muli %337, %c6_i32 : i32
    %c7_i32_84 = arith.constant 7 : i32
    %339 = arith.subi %c7_i32_84, %c6_i32 : i32
    %340 = arith.muli %arg0, %339 : i32
    %341 = arith.addi %338, %340 : i32
    %342 = arith.index_cast %341 : i32 to index
    %c0_85 = arith.constant 0 : index
    %c0_86 = arith.constant 0 : index
    %343 = vector.load %arg3[%342, %c0_85, %c0_86] : memref<8x16x384xbf16, #tpu.memory_space<vmem>>, vector<1x16x384xbf16>
    %344 = vector.shape_cast %343 : vector<1x16x384xbf16> to vector<16x384xbf16>
    %345 = arith.extf %344 : vector<16x384xbf16> to vector<16x384xf32>
    %346 = arith.truncf %336 : vector<16x128xf32> to vector<16x128xbf16>
    %cst_87 = arith.constant dense<0.000000e+00> : vector<16x384xf32>
    %347 = tpu.matmul %346, %4, %cst_87 {dimension_numbers = #tpu.dot_dimension_numbers<[1], [0], [0], [1], [0, 0, 1, 1], [], []>} : vector<16x128xbf16>, vector<128x384xbf16>, vector<16x384xf32> -> vector<16x384xf32>
    %348 = vector.extract_strided_slice %345 {offsets = [0, 0], sizes = [16, 128], strides = [1, 1]} : vector<16x384xf32> to vector<16x128xf32>
    %349 = vector.extract_strided_slice %347 {offsets = [0, 0], sizes = [16, 128], strides = [1, 1]} : vector<16x384xf32> to vector<16x128xf32>
    %350 = arith.addf %348, %349 : vector<16x128xf32>
    %351 = arith.negf %350 : vector<16x128xf32>
    %352 = math.exp %351 : vector<16x128xf32>
    %cst_88 = arith.constant 1.000000e+00 : f32
    %353 = vector.broadcast %cst_88 : f32 to vector<16x128xf32>
    %354 = arith.addf %353, %352 : vector<16x128xf32>
    %355 = arith.divf %353, %354 : vector<16x128xf32>
    %356 = vector.extract_strided_slice %345 {offsets = [0, 128], sizes = [16, 128], strides = [1, 1]} : vector<16x384xf32> to vector<16x128xf32>
    %357 = vector.extract_strided_slice %347 {offsets = [0, 128], sizes = [16, 128], strides = [1, 1]} : vector<16x384xf32> to vector<16x128xf32>
    %358 = arith.addf %356, %357 : vector<16x128xf32>
    %359 = arith.negf %358 : vector<16x128xf32>
    %360 = math.exp %359 : vector<16x128xf32>
    %cst_89 = arith.constant 1.000000e+00 : f32
    %361 = vector.broadcast %cst_89 : f32 to vector<16x128xf32>
    %362 = arith.addf %361, %360 : vector<16x128xf32>
    %363 = arith.divf %361, %362 : vector<16x128xf32>
    %364 = vector.extract_strided_slice %345 {offsets = [0, 256], sizes = [16, 128], strides = [1, 1]} : vector<16x384xf32> to vector<16x128xf32>
    %365 = vector.extract_strided_slice %347 {offsets = [0, 256], sizes = [16, 128], strides = [1, 1]} : vector<16x384xf32> to vector<16x128xf32>
    %366 = arith.addf %365, %8 : vector<16x128xf32>
    %367 = arith.mulf %355, %366 : vector<16x128xf32>
    %368 = arith.addf %364, %367 : vector<16x128xf32>
    %369 = math.tanh %368 : vector<16x128xf32>
    %cst_90 = arith.constant 1.000000e+00 : f32
    %370 = vector.broadcast %cst_90 : f32 to vector<16x128xf32>
    %371 = arith.subf %370, %363 : vector<16x128xf32>
    %372 = arith.mulf %371, %369 : vector<16x128xf32>
    %373 = arith.mulf %363, %336 : vector<16x128xf32>
    %374 = arith.addf %372, %373 : vector<16x128xf32>
    %375 = arith.addi %15, %341 : i32
    %376 = vector.broadcast %375 : i32 to vector<16x1xi32>
    %377 = arith.cmpi slt, %376, %9 : vector<16x1xi32>
    %cst_91 = arith.constant 0.000000e+00 : f32
    %378 = vector.shape_cast %377 : vector<16x1xi1> to vector<16x1xi1>
    %379 = vector.broadcast %378 : vector<16x1xi1> to vector<16x128xi1>
    %380 = vector.broadcast %cst_91 : f32 to vector<16x128xf32>
    %381 = arith.select %379, %374, %380 : vector<16x128xi1>, vector<16x128xf32>
    %382 = arith.truncf %381 : vector<16x128xf32> to vector<16x128xbf16>
    %c0_92 = arith.constant 0 : index
    %383 = arith.index_cast %341 : i32 to index
    %c0_93 = arith.constant 0 : index
    %c0_94 = arith.constant 0 : index
    %384 = vector.load %arg7[%c0_92, %383, %c0_93, %c0_94] : memref<1x8x16x128xbf16, #tpu.memory_space<vmem>>, vector<1x1x16x128xbf16>
    %385 = vector.shape_cast %384 : vector<1x1x16x128xbf16> to vector<16x128xbf16>
    %386 = vector.shape_cast %382 : vector<16x128xbf16> to vector<1x1x16x128xbf16>
    tpu.vector_store %arg7[%c0_92, %383, %c0_93, %c0_94], %386 {strides = array<i32>} : memref<1x8x16x128xbf16, #tpu.memory_space<vmem>>, vector<1x1x16x128xbf16>,
    %387 = vector.shape_cast %377 : vector<16x1xi1> to vector<16x1xi1>
    %388 = vector.broadcast %387 : vector<16x1xi1> to vector<16x128xi1>
    %389 = arith.select %388, %374, %336 : vector<16x128xi1>, vector<16x128xf32>
    %c7_i32_95 = arith.constant 7 : i32
    %c1_i32_96 = arith.constant 1 : i32
    %390 = arith.subi %c1_i32_96, %arg0 : i32
    %391 = arith.muli %390, %c7_i32_95 : i32
    %c7_i32_97 = arith.constant 7 : i32
    %392 = arith.subi %c7_i32_97, %c7_i32_95 : i32
    %393 = arith.muli %arg0, %392 : i32
    %394 = arith.addi %391, %393 : i32
    %395 = arith.index_cast %394 : i32 to index
    %c0_98 = arith.constant 0 : index
    %c0_99 = arith.constant 0 : index
    %396 = vector.load %arg3[%395, %c0_98, %c0_99] : memref<8x16x384xbf16, #tpu.memory_space<vmem>>, vector<1x16x384xbf16>
    %397 = vector.shape_cast %396 : vector<1x16x384xbf16> to vector<16x384xbf16>
    %398 = arith.extf %397 : vector<16x384xbf16> to vector<16x384xf32>
    %399 = arith.truncf %389 : vector<16x128xf32> to vector<16x128xbf16>
    %cst_100 = arith.constant dense<0.000000e+00> : vector<16x384xf32>
    %400 = tpu.matmul %399, %4, %cst_100 {dimension_numbers = #tpu.dot_dimension_numbers<[1], [0], [0], [1], [0, 0, 1, 1], [], []>} : vector<16x128xbf16>, vector<128x384xbf16>, vector<16x384xf32> -> vector<16x384xf32>
    %401 = vector.extract_strided_slice %398 {offsets = [0, 0], sizes = [16, 128], strides = [1, 1]} : vector<16x384xf32> to vector<16x128xf32>
    %402 = vector.extract_strided_slice %400 {offsets = [0, 0], sizes = [16, 128], strides = [1, 1]} : vector<16x384xf32> to vector<16x128xf32>
    %403 = arith.addf %401, %402 : vector<16x128xf32>
    %404 = arith.negf %403 : vector<16x128xf32>
    %405 = math.exp %404 : vector<16x128xf32>
    %cst_101 = arith.constant 1.000000e+00 : f32
    %406 = vector.broadcast %cst_101 : f32 to vector<16x128xf32>
    %407 = arith.addf %406, %405 : vector<16x128xf32>
    %408 = arith.divf %406, %407 : vector<16x128xf32>
    %409 = vector.extract_strided_slice %398 {offsets = [0, 128], sizes = [16, 128], strides = [1, 1]} : vector<16x384xf32> to vector<16x128xf32>
    %410 = vector.extract_strided_slice %400 {offsets = [0, 128], sizes = [16, 128], strides = [1, 1]} : vector<16x384xf32> to vector<16x128xf32>
    %411 = arith.addf %409, %410 : vector<16x128xf32>
    %412 = arith.negf %411 : vector<16x128xf32>
    %413 = math.exp %412 : vector<16x128xf32>
    %cst_102 = arith.constant 1.000000e+00 : f32
    %414 = vector.broadcast %cst_102 : f32 to vector<16x128xf32>
    %415 = arith.addf %414, %413 : vector<16x128xf32>
    %416 = arith.divf %414, %415 : vector<16x128xf32>
    %417 = vector.extract_strided_slice %398 {offsets = [0, 256], sizes = [16, 128], strides = [1, 1]} : vector<16x384xf32> to vector<16x128xf32>
    %418 = vector.extract_strided_slice %400 {offsets = [0, 256], sizes = [16, 128], strides = [1, 1]} : vector<16x384xf32> to vector<16x128xf32>
    %419 = arith.addf %418, %8 : vector<16x128xf32>
    %420 = arith.mulf %408, %419 : vector<16x128xf32>
    %421 = arith.addf %417, %420 : vector<16x128xf32>
    %422 = math.tanh %421 : vector<16x128xf32>
    %cst_103 = arith.constant 1.000000e+00 : f32
    %423 = vector.broadcast %cst_103 : f32 to vector<16x128xf32>
    %424 = arith.subf %423, %416 : vector<16x128xf32>
    %425 = arith.mulf %424, %422 : vector<16x128xf32>
    %426 = arith.mulf %416, %389 : vector<16x128xf32>
    %427 = arith.addf %425, %426 : vector<16x128xf32>
    %428 = arith.addi %15, %394 : i32
    %429 = vector.broadcast %428 : i32 to vector<16x1xi32>
    %430 = arith.cmpi slt, %429, %9 : vector<16x1xi32>
    %cst_104 = arith.constant 0.000000e+00 : f32
    %431 = vector.shape_cast %430 : vector<16x1xi1> to vector<16x1xi1>
    %432 = vector.broadcast %431 : vector<16x1xi1> to vector<16x128xi1>
    %433 = vector.broadcast %cst_104 : f32 to vector<16x128xf32>
    %434 = arith.select %432, %427, %433 : vector<16x128xi1>, vector<16x128xf32>
    %435 = arith.truncf %434 : vector<16x128xf32> to vector<16x128xbf16>
    %c0_105 = arith.constant 0 : index
    %436 = arith.index_cast %394 : i32 to index
    %c0_106 = arith.constant 0 : index
    %c0_107 = arith.constant 0 : index
    %437 = vector.load %arg7[%c0_105, %436, %c0_106, %c0_107] : memref<1x8x16x128xbf16, #tpu.memory_space<vmem>>, vector<1x1x16x128xbf16>
    %438 = vector.shape_cast %437 : vector<1x1x16x128xbf16> to vector<16x128xbf16>
    %439 = vector.shape_cast %435 : vector<16x128xbf16> to vector<1x1x16x128xbf16>
    tpu.vector_store %arg7[%c0_105, %436, %c0_106, %c0_107], %439 {strides = array<i32>} : memref<1x8x16x128xbf16, #tpu.memory_space<vmem>>, vector<1x1x16x128xbf16>,
    %440 = vector.shape_cast %430 : vector<16x1xi1> to vector<16x1xi1>
    %441 = vector.broadcast %440 : vector<16x1xi1> to vector<16x128xi1>
    %442 = arith.select %441, %427, %389 : vector<16x128xi1>, vector<16x128xf32>
    %c8_i32_108 = arith.constant 8 : i32
    %443 = arith.index_cast %arg0 : i32 to index
    %c0_109 = arith.constant 0 : index
    %c0_110 = arith.constant 0 : index
    %444 = vector.load %arg9[%443, %c0_109, %c0_110] : memref<2x16x128xf32, #tpu.memory_space<vmem>>, vector<1x16x128xf32>
    %445 = vector.shape_cast %444 : vector<1x16x128xf32> to vector<16x128xf32>
    %446 = vector.shape_cast %442 : vector<16x128xf32> to vector<1x16x128xf32>
    tpu.vector_store %arg9[%443, %c0_109, %c0_110], %446 {strides = array<i32>} : memref<2x16x128xf32, #tpu.memory_space<vmem>>, vector<1x16x128xf32>,
    %c0_111 = arith.constant 0 : index
    %c0_112 = arith.constant 0 : index
    %c0_113 = arith.constant 0 : index
    %447 = vector.load %arg8[%c0_111, %c0_112, %c0_113] : memref<1x16x128xf32, #tpu.memory_space<vmem>>, vector<1x16x128xf32>
    %448 = vector.shape_cast %447 : vector<1x16x128xf32> to vector<16x128xf32>
    %449 = vector.shape_cast %442 : vector<16x128xf32> to vector<1x16x128xf32>
    tpu.vector_store %arg8[%c0_111, %c0_112, %c0_113], %449 {strides = array<i32>} : memref<1x16x128xf32, #tpu.memory_space<vmem>>, vector<1x16x128xf32>,
    return
  }
  func.func @transform_0(%arg0: i32, %arg1: i32) -> (i32, i32) {
    %c0_i32 = arith.constant 0 : i32
    %c0_i32_0 = arith.constant 0 : i32
    %c0_i32_1 = arith.constant 0 : i32
    return %c0_i32, %c0_i32_0 : i32, i32
  }
  func.func @transform_1(%arg0: i32, %arg1: i32) -> (i32, i32, i32) {
    %c1_i32 = arith.constant 1 : i32
    %0 = arith.subi %c1_i32, %arg0 : i32
    %1 = arith.muli %0, %arg1 : i32
    %c0_i32 = arith.constant 0 : i32
    %2 = arith.subi %c0_i32, %arg1 : i32
    %3 = arith.muli %arg0, %2 : i32
    %4 = arith.addi %1, %3 : i32
    %c0_i32_0 = arith.constant 0 : i32
    %c0_i32_1 = arith.constant 0 : i32
    return %4, %c0_i32_0, %arg0 : i32, i32, i32
  }
  func.func @transform_2(%arg0: i32, %arg1: i32) -> (i32, i32, i32) {
    %c0_i32 = arith.constant 0 : i32
    %c0_i32_0 = arith.constant 0 : i32
    %c0_i32_1 = arith.constant 0 : i32
    return %arg0, %c0_i32, %c0_i32_0 : i32, i32, i32
  }
  func.func @transform_3(%arg0: i32, %arg1: i32) -> (i32, i32, i32) {
    %c0_i32 = arith.constant 0 : i32
    %c0_i32_0 = arith.constant 0 : i32
    %c0_i32_1 = arith.constant 0 : i32
    return %arg0, %c0_i32, %c0_i32_0 : i32, i32, i32
  }
  func.func @transform_4(%arg0: i32, %arg1: i32) -> (i32, i32, i32) {
    %c0_i32 = arith.constant 0 : i32
    %c0_i32_0 = arith.constant 0 : i32
    %c0_i32_1 = arith.constant 0 : i32
    return %arg0, %c0_i32, %c0_i32_0 : i32, i32, i32
  }
  func.func @transform_5(%arg0: i32, %arg1: i32) -> (i32, i32, i32, i32) {
    %c1_i32 = arith.constant 1 : i32
    %0 = arith.subi %c1_i32, %arg0 : i32
    %1 = arith.muli %0, %arg1 : i32
    %c0_i32 = arith.constant 0 : i32
    %2 = arith.subi %c0_i32, %arg1 : i32
    %3 = arith.muli %arg0, %2 : i32
    %4 = arith.addi %1, %3 : i32
    %c0_i32_0 = arith.constant 0 : i32
    %c0_i32_1 = arith.constant 0 : i32
    %c0_i32_2 = arith.constant 0 : i32
    return %arg0, %4, %c0_i32_0, %c0_i32_1 : i32, i32, i32, i32
  }
  func.func @transform_6(%arg0: i32, %arg1: i32) -> (i32, i32, i32) {
    %c0_i32 = arith.constant 0 : i32
    %c0_i32_0 = arith.constant 0 : i32
    %c0_i32_1 = arith.constant 0 : i32
    return %arg0, %c0_i32, %c0_i32_0 : i32, i32, i32
  }
}

</mosaic_0001>

<bundles_post_ra>
// kernel: tpu_custom_call.1
= control target key start
LH: loop header
LB: loop body
LE: loop exit
PB: predicated region body
PF: predicated region fallthrough
CT: control target
= control target key end

     0   :  { %s4345_s0 = inlined_call_operand.vmem [shape: s32[16,1], index: 0, kind: input, shape index: {}]   ;;  %s4346_s1 = inlined_call_operand.hbm [shape: bf16[8,16,768], index: 1, kind: input, shape index: {}]   ;;  %s4347_s2 = inlined_call_operand.hbm [shape: f32[2,16,128], index: 2, kind: input, shape index: {}]   ;;  %s4348_s3 = inlined_call_operand.hbm [shape: bf16[2,128,384], index: 3, kind: input, shape index: {}]   ;;  %s4349_s4 = inlined_call_operand.vmem [shape: f32[2,1,128], index: 4, kind: input, shape index: {}]   ;;  %s4350_s5 = inlined_call_operand.hbm [shape: bf16[2,8,16,128], index: 5, kind: output, shape index: {0}]   ;;  %s4351_s6 = inlined_call_operand.hbm [shape: f32[2,16,128], index: 6, kind: output, shape index: {1}]  }
   0x1   :  { %4359 = sst [smem:[#allocation21_spill]] %s4346_s1 }
   0x2   :  { %4360 = sst [smem:[#allocation22_spill]] %s4347_s2 }
   0x3   :  { %12 = vsyncpa [#allocation4], 0 }
   0x4   :  { %14 = vsyncpa [#allocation4 + $0x1], 0 }
   0x5   :  { %15 = vsyncpa [#allocation7], 0 }
   0x6   :  { %17 = vsyncpa [#allocation7 + $0x1], 0 }
   0x7   :  { %18 = vsyncpa [#allocation5], 0 }
   0x8   :  { %20 = vsyncpa [#allocation5 + $0x1], 0 }
   0x9   :  { %21 = vsyncpa [#allocation11], 0 }
   0xa   :  { %23 = vsyncpa [#allocation11 + $0x1], 0  ;;  %s3317_s21 = smov 0   ;;  %s3319_s22 = smov 0  }
   0xb   :  { %s3321_s23 = smov 0   ;;  %s3323_s24 = smov 0  }
   0xc   :  { %s3325_s25 = smov 0   ;;  %s3327_s26 = smov 0  }
   0xd LB: > { %4361 = sst [smem:[#allocation16_spill]] %s3251_s23  ;;  %s3348_s27 = sadd.s32 4294967295, %s3263_s26   ;;  %s3263_s26 = sphi %s3327_s26, %s29_s26   ;;  %s3259_s25 = sphi %s3325_s25, %s4391_s25   ;;  %s3255_s24 = sphi %s3323_s24, %s4390_s24   ;;  %s3251_s23 = sphi %s3321_s23, %s4386_s23   ;;  %s3247_s22 = sphi %s3319_s22, %s4389_s22   ;;  %s3243_s21 = sphi %s3317_s21, %s4388_s21  }
   0xe   : > { %4362 = sst [smem:[#allocation17_spill]] %s3263_s26  ;;  %s2310_s28 = sadd.s32 4294967294, %s3263_s26  }
   0xf   : > { %s41_s29 = sadd.s32 1, %s3259_s25  ;;  %s81_s30 = sadd.s32 1, %s3251_s23 }
  0x10   : > { %p43_p0 = scmp.ge.s32.totalorder %s41_s29, 2  ;;  %p88_p1 = scmp.ne.s32.totalorder %s3251_s23, %s3247_s22 }
  0x11   : > { %p89_p2 = scmp.eq.s32.totalorder %s3263_s26, 0  ;;  %p94_p3 = scmp.ne.s32.totalorder %s3247_s22, %s3243_s21 }
  0x12   : > { %s4393_s29 = smov (%p43_p0, %s41_s29), 0  ;;  %p95_p5 = scmp.eq.s32.totalorder %s3348_s27, 0 }
  0x13   : > { %4363 = sst [smem:[#allocation18_spill]] %s4393_s29  ;;  %p3360_p4 = por %p89_p2, %p88_p1 }
  0x14   : > { %s77_s8 = ssub.s32 %s3259_s25, %s4393_s29  ;;  %p208_p6 = scmp.eq.s32.totalorder %s3348_s27, 1 }
  0x15   : > { %p79_p7 = scmp.eq.s32.totalorder %s77_s8, 0  ;;  %p3368_p8 = por %p95_p5, %p94_p3 }
  0x16   : > { %p3372_p9 = por %p208_p6, %p88_p1  ;;  %p214_p10 = scmp.eq.s32.totalorder %s2310_s28, 1 }
  0x17   : > { %s4365_s9 = scalar_select %p3368_p8, 1, 0 }
  0x18   : > { %s4366_s10 = scalar_select %p3372_p9, 1, 0 }
  0x19   : > { %s3377_s11 = scalar_select %p79_p7, %s3251_s23, %s81_s30  }
  0x1a   : > { %p3379_p11 = por %p214_p10, %p94_p3  ;;  %p2774_p13 = scmp.lt.s32.totalorder %s3263_s26, 2 }
  0x1b   : > { %4367 = sst [smem:[#allocation19_spill]] %s3377_s11  ;;  %s3386_s13 = sand.u32 1, %s3251_s23  }
  0x1c   : > { %s4368_s12 = scalar_select %p3379_p11, 1, 0 }
  0x1d   : > { %s292_s15 = sand.u32 1, %s3263_s26   ;;  %p3392_p0 = pnand %p2774_p13, %p3360_p4 }
  0x1e   : > { %4369 = sst [smem:[#allocation20_spill]] %s4368_s12  ;;  %s2314_s17 = sshll.u32 %s3386_s13, 4 }
  0x1f   : > { %s2436_s18 = sshll.u32 %s3259_s25, 8  ;;  %s4371_s2 = sld [smem:[#allocation22_spill]] }
  0x20   : > { %s296_s30 = scalar_lea.vmem [#allocation6], %s2314_s17  ;;  %s3406_s7 = scalar_lea.sflag [#allocation7], %s292_s15 }
  0x21   : > { %s303_s8 = sshll.u32 %s296_s30, 4  ;;  %p3412_p3 = pneg %p3392_p0  ;;  %s3403_s8 = int_to_ptr.vmem [resolvable:$true] %s303_s8 }
  0x25   : > { %s3401_s28 = scalar_lea.hbm %s4371_s2, %s2436_s18  ;;  %s3060_s17 = scalar_lea.hbm %s4371_s2, 512 }
  0x26   : > { %s3055_s14 = scalar_lea.hbm %s3401_s28, 256  ;;  %p3061_p6 = scmp.lt.u32.totalorder %s3401_s28, %s4371_s2 }
  0x27   : > { %p3056_p2 = scmp.ne.s32.totalorder %s3401_s28, %s3055_s14  ;;  %p3062_p7 = scmp.lt.u32.totalorder %s3060_s17, %s3055_s14 }
  0x28   : > { %p3064_p13 = scmp.lt.u32.totalorder %s3055_s14, %s3401_s28 }
  0x29   : > { %p3058_p4 = pnand %p3412_p3, %p3056_p2  ;;  %p3063_p10 = por %p3062_p7, %p3061_p6 }
  0x2b   : > { %p3059_p5 = pneg %p3058_p4  ;;  %p3065_p12 = por %p3064_p13, %p3063_p10 }
  0x2d   : > { %p3066_p1 = pnand %p3065_p12, %p3059_p5 }
  0x2f   : > { %3069 = shalt.err (!%p3066_p1)
}
  0x30   : > { %s3070_s15 = scalar_lea.vmem %s3403_s8, 256  ;;  %s3265_s18 = smov [#allocation6]  }
  0x31   : > { %p3071_p2 = scmp.ne.s32.totalorder %s3403_s8, %s3070_s15  ;;  %s3075_s19 = sshll.u32 %s3265_s18, 4  ;;  %s3076_s19 = int_to_ptr.vmem [resolvable:$false] %s3075_s19 }
  0x32   : > { %s3077_s20 = scalar_lea.vmem %s3076_s19, 512  ;;  %p3078_p9 = scmp.lt.s32.totalorder %s3403_s8, %s3076_s19 }
  0x33   : > { %p3073_p4 = pnand %p3071_p2, %p3412_p3  ;;  %p3079_p8 = scmp.lt.s32.totalorder %s3077_s20, %s3070_s15 }
  0x35   : > { %p3074_p11 = pneg %p3073_p4  ;;  %p3080_p6 = por %p3079_p8, %p3078_p9 }
  0x37   : > { %p3081_p7 = pnand %p3080_p6, %p3074_p11 }
  0x39   : > { %3084 = shalt.err (!%p3081_p7)
}
  0x3a   : > { %s3266_s14 = smov 128   ;;  %s3267_s17 = smov 8  }
  0x3b   : > { %2763 = dma.hbm_to_vmem [thread:$0]  (!%p3392_p0), %s3401_s28, 256, %s3403_s8, %s3406_s7, %s3266_s14, %s3266_s14, %s3267_s17  }
  0x3c   : > { %p338_p12 = scmp.lt.s32.totalorder %s3263_s26, 3  ;;  %p4373_p1 = scmp.ge.s32.totalorder %s3263_s26, 1 }
  0x3d   : > { %s2435_s15 = smul.u32 192, %s3259_s25  ;;  %s4376_s1 = sld [smem:[#allocation21_spill]] }
  0x3e   : > { %p3439_p5 = pnand %p4373_p1, %p338_p12  ;;  %s4375_s18 = smul.u32 192, %s3386_s13 }
  0x3f   : > { %s264_s28 = scalar_lea.sflag [#allocation4], %s3386_s13 }
  0x40   : > { %s4374_s30 = scalar_select %p3439_p5, 1, 0 }
  0x41   : > { %s267_s19 = scalar_lea.vmem [#allocation3], %s4375_s18 }
  0x42   : > { %s282_s20 = sshll.u32 %s267_s19, 4  ;;  %s3446_s20 = int_to_ptr.vmem [resolvable:$true] %s282_s20 }
  0x43   : > { %s3451_s23 = scalar_lea.hbm %s4376_s1, %s2435_s15  ;;  %s3090_s18 = scalar_lea.hbm %s4376_s1, 6144 }
  0x44   : > { %s3085_s8 = scalar_lea.hbm %s3451_s23, 3072  ;;  %p3091_p10 = scmp.lt.u32.totalorder %s3451_s23, %s4376_s1 }
  0x45   : > { %p3086_p8 = scmp.ne.s32.totalorder %s3451_s23, %s3085_s8  ;;  %p3092_p13 = scmp.lt.u32.totalorder %s3090_s18, %s3085_s8 }
  0x46   : > { %p3094_p4 = scmp.lt.u32.totalorder %s3085_s8, %s3451_s23 }
  0x47   : > { %p3088_p9 = pnand %p3086_p8, %p3412_p3  ;;  %p3093_p2 = por %p3092_p13, %p3091_p10 }
  0x49   : > { %p3089_p11 = pneg %p3088_p9  ;;  %p3095_p6 = por %p3094_p4, %p3093_p2 }
  0x4b   : > { %p3096_p7 = pnand %p3095_p6, %p3089_p11 }
  0x4d   : > { %3099 = shalt.err (!%p3096_p7)
}
  0x4e   : > { %s3100_s2 = scalar_lea.vmem %s3446_s20, 3072  ;;  %s3268_s11 = smov [#allocation3]  }
  0x4f   : > { %p3101_p12 = scmp.ne.s32.totalorder %s3446_s20, %s3100_s2  ;;  %s3105_s15 = sshll.u32 %s3268_s11, 4  ;;  %s3106_s15 = int_to_ptr.vmem [resolvable:$false] %s3105_s15 }
  0x50   : > { %s3107_s26 = scalar_lea.vmem %s3106_s15, 6144  ;;  %p3108_p9 = scmp.lt.s32.totalorder %s3446_s20, %s3106_s15 }
  0x51   : > { %p3103_p1 = pnand %p3101_p12, %p3412_p3  ;;  %p3109_p5 = scmp.lt.s32.totalorder %s3107_s26, %s3100_s2 }
  0x53   : > { %p3104_p8 = pneg %p3103_p1  ;;  %p3110_p10 = por %p3109_p5, %p3108_p9 }
  0x55   : > { %p3111_p13 = pnand %p3110_p10, %p3104_p8 }
  0x57   : > { %3114 = shalt.err (!%p3111_p13)
}
  0x58   : > { %s3269_s8 = smov 384   ;;  %s3270_s14 = smov 192  }
  0x59   : > { %s3271_s17 = smov 12   ;;  %s2745_s18 = smul.u32 3072, %s3259_s25 }
  0x5a   : > { %2760 = dma.hbm_to_vmem [thread:$0]  (!%p3392_p0), %s3451_s23, 3072, %s3446_s20, %s264_s28, %s3269_s8, %s3270_s14, %s3271_s17  }
  0x5b   : > { %s4377_s19 = smul.u32 192, %s3386_s13  ;;  %s3487_s1 = scalar_lea.hbm %s4348_s3, %s2745_s18 }
  0x5c   : > { %s3115_s12 = scalar_lea.hbm %s3487_s1, 3072  ;;  %s3120_s20 = scalar_lea.hbm %s4348_s3, 6144 }
  0x5d   : > { %s317_s2 = scalar_lea.vmem [#allocation8], %s4377_s19  ;;  %p3116_p5 = scmp.ne.s32.totalorder %s3487_s1, %s3115_s12 }
  0x5e   : > { %s324_s11 = sshll.u32 %s317_s2, 4  ;;  %p3121_p4 = scmp.lt.u32.totalorder %s3487_s1, %s4348_s3  ;;  %s3482_s11 = int_to_ptr.vmem [resolvable:$true] %s324_s11 }
  0x5f   : > { %p3118_p11 = pnand %p3116_p5, %p3412_p3  ;;  %p3122_p6 = scmp.lt.u32.totalorder %s3120_s20, %s3115_s12 }
  0x60   : > { %p3124_p12 = scmp.lt.u32.totalorder %s3115_s12, %s3487_s1 }
  0x61   : > { %p3119_p2 = pneg %p3118_p11  ;;  %p3123_p7 = por %p3122_p6, %p3121_p4 }
  0x63   : > { %p3125_p1 = por %p3124_p12, %p3123_p7 }
  0x65   : > { %p3126_p8 = pnand %p3125_p1, %p3119_p2 }
  0x67   : > { %3129 = shalt.err (!%p3126_p8)
}
  0x68   : > { %s3130_s18 = scalar_lea.vmem %s3482_s11, 3072  ;;  %s3272_s19 = smov [#allocation8]  }
  0x69   : > { %p3131_p9 = scmp.ne.s32.totalorder %s3482_s11, %s3130_s18  ;;  %s3135_s2 = sshll.u32 %s3272_s19, 4  ;;  %s3136_s2 = int_to_ptr.vmem [resolvable:$false] %s3135_s2 }
  0x6a   : > { %s3137_s15 = scalar_lea.vmem %s3136_s2, 6144  ;;  %p3138_p5 = scmp.lt.s32.totalorder %s3482_s11, %s3136_s2 }
  0x6b   : > { %p3133_p10 = pnand %p3131_p9, %p3412_p3  ;;  %p3139_p11 = scmp.lt.s32.totalorder %s3137_s15, %s3130_s18 }
  0x6d   : > { %p3134_p13 = pneg %p3133_p10  ;;  %p3140_p4 = por %p3139_p11, %p3138_p5 }
  0x6f   : > { %p3141_p6 = pnand %p3140_p4, %p3134_p13 }
  0x71   : > { %3144 = shalt.err (!%p3141_p6)
}
  0x72   : > { %2766 = dma.hbm_to_vmem [thread:$0]  (!%p3392_p0), %s3487_s1, 3072, %s3482_s11, %s3406_s7, %s3270_s14, %s3270_s14, %s3271_s17  }
  0x73   : > { %p4378_p3 = scmp.ne.s32.totalorder %s4374_s30, 0 }
  0x74   : > { %s3517_s29 = sand.u32 (!%p4378_p3), 1, %s3247_s22   ;;  %p4379_p2 = scmp.ne.s32.totalorder (!%p4378_p3), %s4365_s9, 0 }
  0x75   : > { %342 = sbr.rel (%p4378_p3) target bundleno = 2312 (0x908), region = 40  ;;  %s345_s26 = scalar_lea.sflag (!%p4378_p3), [#allocation4], %s3517_s29 }
  0x76   : > { %s2746_s12 = smul.u32 (!%p4378_p3), 192, %s3517_s29 }
  0x78   : > { %s3521_s23 = scalar_lea.vmem (!%p4378_p3), [#allocation3], %s2746_s12 }
  0x7c   : > { %3226 = dma.done.wait (%p4379_p2), %s345_s26, 3072  }
  0x7d   : > { %3228 = vsyncadd (%p4379_p2), %s345_s26, 4294964224  ;;  %s353_s1 = sand.u32 1, %s3348_s27   ;;  %s2319_s16 = sshll.u32 %s3517_s29, 4 }
  0x7e   : > { %s354_s7 = scalar_lea.sflag [#allocation7], %s353_s1  ;;  %s3531_s30 = scalar_lea.vmem [#allocation6], %s2319_s16 }
  0x7f   : > { %3230 = dma.done.wait (%p4379_p2), %s354_s7, 3328  }
  0x80   : > { %3232 = vsyncadd (%p4379_p2), %s354_s7, 4294963968  ;;  %v3273_v0 = vmov 0.0   ;;  %v3274_v1 = vmov 0   ;;  %vm3275_vm0 = vmmov 0   ;;  %s3543_s27 = scalar_lea.vmem [#allocation8], %s2746_s12  ;;  %s3575_s9 = ssub.s32 1, %s3255_s24 }
  0x81   : > { %2583 = vmatprep.subr.bf16.mxu1 %v3273_v0  ;;  %666 = vmatprep.mubr.bf16.mxu0 %v3274_v1  ;;  %v3546_v2 = vld [vmem:[%s3543_s27 + $0x4] ss:$12 sps:$4 sm:$0xff]   ;;  %v3549_v3 = vld [vmem:[%s3543_s27] ss:$12 sps:$4 sm:$0xff]   ;;  %v3553_v4 = vld [vmem:[%s3543_s27 + $0x1c] ss:$12 sps:$4 sm:$0xff]  }
  0x82   : > { %2599 = vmatprep.mubr.msk.bf16.mxu1 %vm3275_vm0, %v3273_v0  ;;  %2836 = vset.pattern.permute.xlu0 %v3274_v1  ;;  %v3557_v5 = vld [vmem:[%s3543_s27 + $0x18] ss:$12 sps:$4 sm:$0xff]   ;;  %v3561_v6 = vld [vmem:[%s3543_s27 + $0x34] ss:$12 sps:$4 sm:$0xff]   ;;  %v3565_v7 = vld [vmem:[%s3543_s27 + $0x30] ss:$12 sps:$4 sm:$0xff]  }
  0x83   : > { %2837 = vset.pattern.permute.xlu1 %v3274_v1  ;;  %634 = vmatprep.subr.bf16.mxu0 %v3546_v2  ;;  %v3569_v8 = vld [vmem:[%s3543_s27 + $0x4c] ss:$12 sps:$4 sm:$0xff]   ;;  %v3572_v9 = vld [vmem:[%s3543_s27 + $0x8] ss:$12 sps:$4 sm:$0xff]   ;;  %v3584_v11 = vld [vmem:[%s3543_s27 + $0x64] ss:$12 sps:$4 sm:$0xff]  }
  0x84   : > { %635 = vmatpush1.bf16.msra.mxu0 %v3549_v3  ;;  %v3579_v10 = vld [vmem:[%s3543_s27 + $0x48] ss:$12 sps:$4 sm:$0xff]   ;;  %2584 = vmatpush3.bf16.msra.mxu1 %v3572_v9  ;;  %v3588_v12 = vld [vmem:[%s3543_s27 + $0x20] ss:$12 sps:$4 sm:$0xff]   ;;  %s491_s14 = smul.u32 7, %s3255_s24  ;;  %s2368_s17 = sshll.u32 %s3575_s9, 1 }
  0x85   : > { %636 = vmatprep.subr.bf16.mxu0 %v3553_v4  ;;  %2585 = vmatprep.subr.bf16.mxu1 %v3273_v0  ;;  %s969_s11 = smul.u32 5, %s3255_s24  ;;  %v3594_v13 = vld [vmem:[%s3543_s27 + $0x60] ss:$12 sps:$4 sm:$0xff]   ;;  %v3599_v14 = vld [vmem:[%s3543_s27 + $0x38] ss:$12 sps:$4 sm:$0xff]   ;;  %s2378_s2 = sshll.u32 %s3255_s24, 2 }
  0x86   : > { %v3603_v15 = vld [vmem:[%s3543_s27 + $0x7c] ss:$12 sps:$4 sm:$0xff]   ;;  %v763_v16 = vstv %s491_s14  ;;  %s1144_s13 = smul.u32 3, %s3575_s9  ;;  %v3608_v17 = vld [vmem:[%s3543_s27 + $0x78] ss:$12 sps:$4 sm:$0xff]   ;;  %s2388_s26 = sshll.u32 %s3575_s9, 2 }
  0x87   : > { %s3610_s20 = sadd.s32 %s2368_s17, %s969_s11  ;;  %v3615_v18 = vld [vmem:[%s3543_s27 + $0x50] ss:$12 sps:$4 sm:$0xff]   ;;  %v3620_v19 = vld [vmem:[%s4345_s0] sm:$0xff]  ;;  %v3625_v20 = vld [vmem:[%s4345_s0 + $0x8] sm:$0xff]  ;;  %s1321_s12 = smul.u32 3, %s3255_s24 }
  0x88   : > { %637 = vmatpush1.bf16.msra.mxu0 %v3557_v5  ;;  %2586 = vmatpush3.bf16.msra.mxu1 %v3588_v12  ;;  %v3630_v21 = vld [vmem:[%s3543_s27 + $0x94] ss:$12 sps:$4 sm:$0xff]   ;;  %vm764_vm1 = vcmp.lt.s32.totalorder %v763_v16, %v3620_v19  ;;  %vm765_vm2 = vcmp.lt.s32.totalorder %v763_v16, %v3625_v20  ;;  %v1114_v23 = vstv %s3610_s20  ;;  %s3637_s15 = sadd.s32 %s2378_s2, %s1144_s13  ;;  %v3642_v24 = vld [vmem:[%s3543_s27 + $0x90] ss:$12 sps:$4 sm:$0xff]   ;;  %v3652_v27 = vld [vmem:[%s3543_s27 + $0xac] ss:$12 sps:$4 sm:$0xff]  }
  0x89   : > { %638 = vmatprep.subr.bf16.mxu0 %v3561_v6  ;;  %2587 = vmatprep.subr.bf16.mxu1 %v3273_v0  ;;  %v766_v22 = vsel %vm764_vm1, 1, %v3274_v1  ;;  %v3646_v25 = vld [vmem:[%s3543_s27 + $0x68] ss:$12 sps:$4 sm:$0xff]   ;;  %v767_v26 = vsel %vm765_vm2, 1, %v3274_v1  ;;  %vm1115_vm3 = vcmp.lt.s32.totalorder %v1114_v23, %v3620_v19  ;;  %v1290_v28 = vstv %s3637_s15  ;;  %s3662_s1 = sadd.s32 %s2388_s26, %s1321_s12  ;;  %s1496_s7 = smul.u32 5, %s3575_s9 }
  0x8a   : > { %769 = vperm.xlu0 %2836, %v766_v22   ;;  %v3660_v29 = vld [vmem:[%s3543_s27 + $0xa8] ss:$12 sps:$4 sm:$0xff]   ;;  %v3674_v32 = vld [vmem:[%s3543_s27 + $0x80] ss:$12 sps:$4 sm:$0xff]   ;;  %v1117_v33 = vsel %vm1115_vm3, 1, %v3274_v1  ;;  %s2398_s14 = sshll.u32 %s3255_s24, 1  ;;  %vm1291_vm4 = vcmp.lt.s32.totalorder %v1290_v28, %v3620_v19  ;;  %v1466_v34 = vstv %s3662_s1  ;;  %vm1116_vm11 = vcmp.lt.s32.totalorder %v1114_v23, %v3625_v20 }
  0x8b   : > { %v3667_v30 = vld [vmem:[%s3531_s30] sm:$0xff]  ;;  %v3670_v31 = vld [vmem:[%s3531_s30 + $0x8] sm:$0xff]  ;;  %s3686_s30 = sadd.s32 %s2398_s14, %s1496_s7  ;;  %s1672_s17 = smul.u32 6, %s3575_s9  ;;  %v1293_v37 = vsel %vm1291_vm4, 1, %v3274_v1  ;;  %vm1467_vm5 = vcmp.lt.s32.totalorder %v1466_v34, %v3620_v19  ;;  %v1118_v49 = vsel %vm1116_vm11, 1, %v3274_v1  ;;  %vm1292_vm12 = vcmp.lt.s32.totalorder %v1290_v28, %v3625_v20 }
  0x8c   : > { %639 = vmatpush1.bf16.msra.mxu0 %v3565_v7  ;;  %2588 = vmatpush3.bf16.msra.mxu1 %v3599_v14  ;;  %v505_v35 = vpack.c.bf16 %v3670_v31, %v3667_v30  ;;  %v3692_v36 = vld [vmem:[%s3543_s27 + $0x98] ss:$12 sps:$4 sm:$0xff]   ;;  %v1642_v38 = vstv %s3686_s30  ;;  %v3706_v39 = vld [vmem:[%s3543_s27 + $0xb0] ss:$12 sps:$4 sm:$0xff]   ;;  %v1469_v40 = vsel %vm1467_vm5, 1, %v3274_v1  ;;  %s1847_s13 = smul.u32 7, %s3575_s9  ;;  %vm1468_vm13 = vcmp.lt.s32.totalorder %v1466_v34, %v3625_v20 }
  0x8d   : > { %640 = vmatprep.subr.bf16.mxu0 %v3569_v8  ;;  %2589 = vmatprep.subr.bf16.mxu1 %v3273_v0  ;;  %s3702_s11 = sadd.s32 %s3255_s24, %s1672_s17  ;;  %vm1643_vm6 = vcmp.lt.s32.totalorder %v1642_v38, %v3620_v19  ;;  %s793_s28 = smul.u32 6, %s3255_s24  ;;  %v1294_v50 = vsel %vm1292_vm12, 1, %v3274_v1  ;;  %v1470_v51 = vsel %vm1468_vm13, 1, %v3274_v1  ;;  %vm1644_vm14 = vcmp.lt.s32.totalorder %v1642_v38, %v3625_v20 }
  0x8e   : > { %772 = vperm.xlu0 %2836, %v767_v26   ;;  %v1817_v41 = vstv %s3702_s11  ;;  %v1645_v42 = vsel %vm1643_vm6, 1, %v3274_v1  ;;  %v3726_v43 = vstv %s1847_s13  ;;  %v1646_v52 = vsel %vm1644_vm14, 1, %v3274_v1  ;;  %s2437_s18 = smul.u32 168, %s3255_s24  ;;  %p420_p0 = scmp.lt.s32.totalorder %s3255_s24, 1 }
  0x8f   : > { %vm1818_vm7 = vcmp.lt.s32.totalorder %v1817_v41, %v3620_v19  ;;  %vm1992_vm8 = vcmp.lt.s32.totalorder %v3726_v43, %v3620_v19  ;;  %s3764_s8 = sadd.s32 %s793_s28, %s3575_s9  ;;  %vm1819_vm15 = vcmp.lt.s32.totalorder %v1817_v41, %v3625_v20  ;;  %vm1993_vm1 = vcmp.lt.s32.totalorder %v3726_v43, %v3625_v20  ;;  %s2320_s14 = sshll.u32 %s3517_s29, 6 }
  0x90   : > { %641 = vmatpush1.bf16.msra.mxu0 %v3579_v10  ;;  %2590 = vmatpush3.bf16.msra.mxu1 %v3615_v18  ;;  %v1820_v44 = vsel %vm1818_vm7, 1, %v3274_v1  ;;  %v1994_v45 = vsel %vm1992_vm8, 1, %v3274_v1  ;;  %v938_v46 = vstv %s3764_s8  ;;  %v1821_v53 = vsel %vm1819_vm15, 1, %v3274_v1  ;;  %s3796_s19 = scalar_lea.vmem %s3521_s23, %s2437_s18 [#allocation3]  ;;  %s2440_s17 = smul.u32 56, %s3255_s24 }
  0x91   : > { %642 = vmatprep.subr.bf16.mxu0 %v3584_v11  ;;  %2591 = vmatprep.subr.bf16.mxu1 %v3273_v0  ;;  %vm939_vm9 = vcmp.lt.s32.totalorder %v938_v46, %v3620_v19  ;;  %vm940_vm10 = vcmp.lt.s32.totalorder %v938_v46, %v3625_v20  ;;  %v1995_v54 = vsel %vm1993_vm1, 1, %v3274_v1  ;;  %v495_v55 = vld [vmem:[%s3796_s19] sm:$0xff]  ;;  %v497_v56 = vld [vmem:[%s3796_s19 + $0xc] sm:$0xff]  ;;  %s421_s2 = scalar_select %p420_p0, %s3255_s24, 1 }
  0x92   : > { %1120 = vperm.xlu0 %2836, %v1117_v33   ;;  %v941_v47 = vsel %vm939_vm9, 1, %v3274_v1  ;;  %v942_v48 = vsel %vm940_vm10, 1, %v3274_v1  ;;  %v499_v57 = vunpack.c.l.bf16 %v495_v55  ;;  %v502_v58 = vunpack.c.l.bf16 %v497_v56  ;;  %s3817_s13 = scalar_lea.vmem [#allocation9], %s2320_s14  ;;  %s2441_s18 = smul.u32 24, %s3764_s8 }
  0x93   : > { %944 = vperm.xlu1 %2837, %v941_v47   ;;  %v500_v60 = vunpack.c.h.bf16 %v495_v55  ;;  %v503_v16 = vunpack.c.h.bf16 %v497_v56  ;;  %s3805_s7 = scalar_lea.vmem %s4349_s4, %s421_s2  ;;  %s788_s28 = scalar_lea.vmem %s3817_s13, %s2440_s17 [#allocation9] }
  0x94   : > { %643 = vmatpush1.bf16.msra.mxu0 %v3594_v13  ;;  %2592 = vmatpush3.bf16.msra.mxu1 %v3646_v25  ;;  %v3808_v46 = vld [vmem:[%s3805_s7] ss:$0 sm:$0xff]  ;;  %s2444_s2 = sshll.u32 %s3764_s8, 3  ;;  %s2445_s8 = smul.u32 24, %s3610_s20 }
  0x95   : > { %644 = vmatprep.subr.bf16.mxu0 %v3603_v15  ;;  %2593 = vmatprep.subr.bf16.mxu1 %v3273_v0  ;;  %s963_s12 = scalar_lea.vmem %s3817_s13, %s2444_s2 [#allocation9]  ;;  %s2448_s14 = sshll.u32 %s3610_s20, 3 }
  0x96   : > { %1296 = vperm.xlu0 %2836, %v1293_v37   ;;  %s3921_s26 = scalar_lea.vmem %s3521_s23, %s2445_s8 [#allocation3]  ;;  %s1139_s17 = scalar_lea.vmem %s3817_s13, %s2448_s14 [#allocation9] }
  0x97   : > { %947 = vperm.xlu1 %2837, %v942_v48   ;;  %v496_v48 = vld [vmem:[%s3796_s19 + $0x8] ss:$12 sps:$4 sm:$0xff]   ;;  %s3865_s19 = scalar_lea.vmem %s3521_s23, %s2441_s18 [#allocation3]  ;;  %s2449_s20 = smul.u32 24, %s3637_s15 }
  0x98   : > { %645 = vmatpush1.bf16.msra.mxu0 %v3608_v17  ;;  %2594 = vmatpush3.bf16.msra.mxu1 %v3674_v32  ;;  %v504_v55 = vunpack.c.h.bf16 %v496_v48  ;;  %s2452_s18 = sshll.u32 %s3637_s15, 3  ;;  %s2453_s15 = smul.u32 24, %s3662_s1 }
  0x99   : > { %646 = vmatprep.subr.bf16.mxu0 %v3630_v21  ;;  %2595 = vmatprep.subr.bf16.mxu1 %v3273_v0  ;;  %p4380_p12 = scmp.ne.s32.totalorder %s4366_s10, 0 }
  0x9a   : > { %1472 = vperm.xlu0 %2836, %v1469_v40   ;;  %s4105_s2 = scalar_lea.vmem %s3521_s23, %s2453_s15 [#allocation3]  ;;  %s412_s15 = scalar_lea.vmem [#allocation10], %s2319_s16 }
  0x9b   : > { %1123 = vperm.xlu1 %2837, %v1118_v49  }
  0x9c   : > { %647 = vmatpush1.bf16.msra.mxu0 %v3642_v24  ;;  %2596 = vmatpush3.bf16.msra.mxu1 %v3692_v36 }
  0x9d   : > { %648 = vmatprep.subr.bf16.mxu0 %v3652_v27  ;;  %2597 = vmatprep.subr.bf16.mxu1 %v3273_v0 }
  0x9e   : > { %1648 = vperm.xlu0 %2836, %v1645_v42  }
  0x9f   : > { %1299 = vperm.xlu1 %2837, %v1294_v50  }
  0xa0   : > { %649 = vmatpush1.bf16.msra.mxu0 %v3660_v29  ;;  %2598 = vmatpush3.bf16.msra.mxu1 %v3706_v39 }
  0xa1   : > { %809 = vmatprep.subr.bf16.mxu0 %v3546_v2  ;;  %2603 = vmatprep.subr.bf16.mxu1 %v3273_v0 }
  0xa2   : > { %1823 = vperm.xlu0 %2836, %v1820_v44  }
  0xa3   : > { %667 = vmatmul.mubr.bf16.vlgmr.msra.gmra.mrb[0].mxu0 %v505_v35  ;;  %2600 = vmatmul.mubr.bf16.vlgmr.msra.gmra.mrb[0].mxu1 %v505_v35 }
  0xa4   : > { %810 = vmatpush1.bf16.msra.mxu0 %v3549_v3  ;;  %841 = vmatprep.mubr.bf16.mxu0 %v3274_v1 }
  0xa5   : > { %811 = vmatprep.subr.bf16.mxu0 %v3553_v4  ;;  %2604 = vmatpush3.bf16.msra.mxu1 %v3572_v9 }
  0xa6   : > { %2605 = vmatprep.subr.bf16.mxu1 %v3273_v0  ;;  %2619 = vmatprep.mubr.msk.bf16.mxu1 %vm3275_vm0, %v3273_v0 }
  0xa7   : > { %1997 = vperm.xlu0 %2836, %v1994_v45   ;;  %1475 = vperm.xlu1 %2837, %v1470_v51  }
  0xa8   : > { %812 = vmatpush1.bf16.msra.mxu0 %v3557_v5 }
  0xa9   : > { %813 = vmatprep.subr.bf16.mxu0 %v3561_v6  ;;  %2606 = vmatpush3.bf16.msra.mxu1 %v3588_v12 }
  0xaa   : > { %2607 = vmatprep.subr.bf16.mxu1 %v3273_v0 }
  0xab   : > { %1651 = vperm.xlu1 %2837, %v1646_v52   ;;  %v501_v52 = vunpack.c.l.bf16 %v496_v48 }
  0xac   : > { %814 = vmatpush1.bf16.msra.mxu0 %v3565_v7 }
  0xad   : > { %815 = vmatprep.subr.bf16.mxu0 %v3569_v8  ;;  %2608 = vmatpush3.bf16.msra.mxu1 %v3599_v14 }
  0xae   : > { %2609 = vmatprep.subr.bf16.mxu1 %v3273_v0 }
  0xaf   : > { %1826 = vperm.xlu1 %2837, %v1821_v53  }
  0xb0   : > { %816 = vmatpush1.bf16.msra.mxu0 %v3579_v10 }
  0xb1   : > { %817 = vmatprep.subr.bf16.mxu0 %v3584_v11  ;;  %2610 = vmatpush3.bf16.msra.mxu1 %v3615_v18 }
  0xb2   : > { %2611 = vmatprep.subr.bf16.mxu1 %v3273_v0 }
  0xb3   : > { %2000 = vperm.xlu1 %2837, %v1995_v54  }
  0xb4   : > { %818 = vmatpush1.bf16.msra.mxu0 %v3594_v13 }
  0xb5   : > { %819 = vmatprep.subr.bf16.mxu0 %v3603_v15  ;;  %2612 = vmatpush3.bf16.msra.mxu1 %v3646_v25 }
  0xb6   : > { %2613 = vmatprep.subr.bf16.mxu1 %v3273_v0 }
  0xb8   : > { %820 = vmatpush1.bf16.msra.mxu0 %v3608_v17 }
  0xb9   : > { %821 = vmatprep.subr.bf16.mxu0 %v3630_v21  ;;  %2614 = vmatpush3.bf16.msra.mxu1 %v3674_v32 }
  0xba   : > { %2615 = vmatprep.subr.bf16.mxu1 %v3273_v0 }
  0xbc   : > { %822 = vmatpush1.bf16.msra.mxu0 %v3642_v24 }
  0xbd   : > { %823 = vmatprep.subr.bf16.mxu0 %v3652_v27  ;;  %2616 = vmatpush3.bf16.msra.mxu1 %v3692_v36 }
  0xbe   : > { %2617 = vmatprep.subr.bf16.mxu1 %v3273_v0 }
  0xc0   : > { %824 = vmatpush1.bf16.msra.mxu0 %v3660_v29 }
  0xc1   : > { %985 = vmatprep.subr.bf16.mxu0 %v3546_v2  ;;  %2618 = vmatpush3.bf16.msra.mxu1 %v3706_v39 }
  0xc2   : > { %2623 = vmatprep.subr.bf16.mxu1 %v3273_v0 }
 0x176   : > { %v668_v59 = vpop.f32.mrb[0].mxu0  ;;  %v711_v34 = vpop.f32.mrb[0].mxu1 }
 0x177   : > { %v718_v61 = vadd.f32 %v668_v59, %v499_v57  ;;  %v670_v62 = vpop.f32.mrb[1].mxu0  ;;  %v2601_v35 = vpop.f32.mrb[1].mxu1  ;;  %v746_v50 = vadd.f32 %v3808_v46, %v711_v34 }
 0x178   : > { %v672_v63 = vpop.f32.mrb[2].mxu0  ;;  %v732_v23 = vadd.f32 %v670_v62, %v500_v60  ;;  %v714_v38 = vpop.f32.mrb[2].mxu1 }
 0x179   : > { %v2351_v19 = vmul.f32 -1.442695, %v718_v61  ;;  %v719_v20 = vadd.f32 %v672_v63, %v502_v58  ;;  %v674_v22 = vpop.f32.mrb[3].mxu0  ;;  %v2602_v40 = vpop.f32.mrb[3].mxu1  ;;  %v747_v56 = vadd.f32 %v3808_v46, %v714_v38 }
 0x17a   : > { %v733_v28 = vadd.f32 %v674_v22, %v503_v16  ;;  %v2353_v33 = vmul.f32 -1.442695, %v732_v23  ;;  %v770_v16 = vpop.permute.xlu0 %769 }
 0x17b   : > { %2870 = vpow2.f32 %v2351_v19  ;;  %v2352_v26 = vmul.f32 -1.442695, %v719_v20  ;;  %vm774_vm2 = vcmp.eq.s32.totalorder %v770_v16, 1 }
 0x17c   : > { %v2354_v37 = vmul.f32 -1.442695, %v733_v28 }
 0x17d   : > { %2872 = vpow2.f32 %v2352_v26 }
 0x17e   : > { %2874 = vpow2.f32 %v2353_v33  ;;  %v773_v35 = vpop.permute.xlu0 %772 }
 0x17f   : > { %2876 = vpow2.f32 %v2354_v37  ;;  %vm775_vm3 = vcmp.eq.s32.totalorder %v773_v35, 1 }
 0x185   : > { %v2871_v41 = vpop.eup %2870 }
 0x186   : > { %v726_v42 = vadd.f32 1.0, %v2871_v41 }
 0x187   : > { %v2873_v43 = vpop.eup %2872 }
 0x188   : > { %2878 = vrcp.f32 %v726_v42  ;;  %v727_v44 = vadd.f32 1.0, %v2873_v43  ;;  %v2875_v45 = vpop.eup %2874 }
 0x189   : > { %v2877_v47 = vpop.eup %2876  ;;  %v740_v49 = vadd.f32 1.0, %v2875_v45 }
 0x18a   : > { %2880 = vrcp.f32 %v727_v44  ;;  %v741_v51 = vadd.f32 1.0, %v2877_v47 }
 0x18b   : > { %2882 = vrcp.f32 %v740_v49 }
 0x18c   : > { %2884 = vrcp.f32 %v741_v51 }
 0x192   : > { %v2879_v53 = vpop.eup %2878 }
 0x193   : > { %v748_v54 = vmul.f32 %v2879_v53, %v746_v50 }
 0x194   : > { %v2881_v57 = vpop.eup %2880 }
 0x195   : > { %v750_v58 = vadd.f32 %v748_v54, %v501_v52  ;;  %v749_v59 = vmul.f32 %v2881_v57, %v747_v56  ;;  %v2883_v61 = vpop.eup %2882 }
 0x196   : > { %v2885_v62 = vpop.eup %2884  ;;  %v754_v63 = vsub.f32 1.0, %v2883_v61  ;;  %v758_v20 = vmul.f32 %v2883_v61, %v3667_v30 }
 0x197   : > { %2886 = vtanh.f32 %v750_v58  ;;  %v751_v60 = vadd.f32 %v749_v59, %v504_v55  ;;  %v755_v22 = vsub.f32 1.0, %v2885_v62  ;;  %v759_v28 = vmul.f32 %v2885_v62, %v3670_v31 }
 0x199   : > { %2888 = vtanh.f32 %v751_v60 }
 0x1a1   : > { %v2887_v19 = vpop.eup %2886 }
 0x1a2   : > { %v756_v23 = vmul.f32 %v2887_v19, %v754_v63 }
 0x1a3   : > { %v2889_v26 = vpop.eup %2888 }
 0x1a4   : > { %v757_v33 = vmul.f32 %v2889_v26, %v755_v22  ;;  %v760_v34 = vadd.f32 %v758_v20, %v756_v23 }
 0x1a6   : > { %v761_v37 = vadd.f32 %v759_v28, %v757_v33  ;;  %v776_v38 = vsel %vm774_vm2, %v760_v34, 0.0  ;;  %v3821_v41 = vsel %vm774_vm2, %v760_v34, %v3667_v30  ;;  %v798_v30 = vld [vmem:[%s3865_s19] sm:$0xff]  ;;  %v799_v34 = vld [vmem:[%s3865_s19 + $0x8] ss:$12 sps:$4 sm:$0xff]  }
 0x1a7   : > { %v802_v45 = vunpack.c.l.bf16 %v798_v30  ;;  %v803_v47 = vunpack.c.h.bf16 %v798_v30  ;;  %v807_v30 = vunpack.c.h.bf16 %v799_v34 }
 0x1a8   : > { %v777_v40 = vsel %vm775_vm3, %v761_v37, 0.0  ;;  %v3824_v42 = vsel %vm775_vm3, %v761_v37, %v3670_v31  ;;  %v800_v31 = vld [vmem:[%s3865_s19 + $0xc] sm:$0xff]  ;;  %v804_v37 = vunpack.c.l.bf16 %v799_v34  ;;  %s1315_s19 = scalar_lea.vmem %s3817_s13, %s2452_s18 [#allocation9] }
 0x1a9   : > { %v2474_v43 = vpack.c.bf16 %v777_v40, %v776_v38  ;;  %v808_v44 = vpack.c.bf16 %v3824_v42, %v3821_v41  ;;  %v805_v48 = vunpack.c.l.bf16 %v800_v31  ;;  %v806_v51 = vunpack.c.h.bf16 %v800_v31 }
 0x1ab   : > { %2475 = vst [vmem:[%s788_s28] sm:$0xff] %v2474_v43   ;;  %842 = vmatmul.mubr.bf16.vlgmr.msra.gmra.mrb[4].mxu0 %v808_v44  ;;  %2620 = vmatmul.mubr.bf16.vlgmr.msra.gmra.mrb[4].mxu1 %v808_v44  ;;  %s3992_s28 = scalar_lea.vmem %s3521_s23, %s2449_s20 [#allocation3] }
 0x1ac   : > { %986 = vmatpush1.bf16.msra.mxu0 %v3549_v3  ;;  %2624 = vmatpush3.bf16.msra.mxu1 %v3572_v9 }
 0x1ad   : > { %987 = vmatprep.subr.bf16.mxu0 %v3553_v4  ;;  %2625 = vmatprep.subr.bf16.mxu1 %v3273_v0 }
 0x1ae   : > { %1017 = vmatprep.mubr.bf16.mxu0 %v3274_v1  ;;  %2639 = vmatprep.mubr.msk.bf16.mxu1 %vm3275_vm0, %v3273_v0 }
 0x1b0   : > { %988 = vmatpush1.bf16.msra.mxu0 %v3557_v5  ;;  %2626 = vmatpush3.bf16.msra.mxu1 %v3588_v12 }
 0x1b1   : > { %989 = vmatprep.subr.bf16.mxu0 %v3561_v6  ;;  %2627 = vmatprep.subr.bf16.mxu1 %v3273_v0 }
 0x1b4   : > { %990 = vmatpush1.bf16.msra.mxu0 %v3565_v7  ;;  %2628 = vmatpush3.bf16.msra.mxu1 %v3599_v14 }
 0x1b5   : > { %991 = vmatprep.subr.bf16.mxu0 %v3569_v8  ;;  %2629 = vmatprep.subr.bf16.mxu1 %v3273_v0 }
 0x1b8   : > { %992 = vmatpush1.bf16.msra.mxu0 %v3579_v10  ;;  %2630 = vmatpush3.bf16.msra.mxu1 %v3615_v18 }
 0x1b9   : > { %993 = vmatprep.subr.bf16.mxu0 %v3584_v11  ;;  %2631 = vmatprep.subr.bf16.mxu1 %v3273_v0 }
 0x1bc   : > { %994 = vmatpush1.bf16.msra.mxu0 %v3594_v13  ;;  %2632 = vmatpush3.bf16.msra.mxu1 %v3646_v25 }
 0x1bd   : > { %995 = vmatprep.subr.bf16.mxu0 %v3603_v15  ;;  %2633 = vmatprep.subr.bf16.mxu1 %v3273_v0 }
 0x1c0   : > { %996 = vmatpush1.bf16.msra.mxu0 %v3608_v17  ;;  %2634 = vmatpush3.bf16.msra.mxu1 %v3674_v32 }
 0x1c1   : > { %997 = vmatprep.subr.bf16.mxu0 %v3630_v21  ;;  %2635 = vmatprep.subr.bf16.mxu1 %v3273_v0 }
 0x1c4   : > { %998 = vmatpush1.bf16.msra.mxu0 %v3642_v24  ;;  %2636 = vmatpush3.bf16.msra.mxu1 %v3692_v36 }
 0x1c5   : > { %999 = vmatprep.subr.bf16.mxu0 %v3652_v27  ;;  %2637 = vmatprep.subr.bf16.mxu1 %v3273_v0 }
 0x1c8   : > { %1000 = vmatpush1.bf16.msra.mxu0 %v3660_v29  ;;  %2638 = vmatpush3.bf16.msra.mxu1 %v3706_v39 }
 0x1c9   : > { %1161 = vmatprep.subr.bf16.mxu0 %v3546_v2  ;;  %2643 = vmatprep.subr.bf16.mxu1 %v3273_v0 }
 0x27e   : > { %v843_v49 = vpop.f32.mrb[4].mxu0  ;;  %v886_v50 = vpop.f32.mrb[4].mxu1 }
 0x27f   : > { %v893_v52 = vadd.f32 %v843_v49, %v802_v45  ;;  %v845_v53 = vpop.f32.mrb[5].mxu0  ;;  %v2621_v54 = vpop.f32.mrb[5].mxu1  ;;  %v921_v38 = vadd.f32 %v3808_v46, %v886_v50 }
 0x280   : > { %v907_v55 = vadd.f32 %v845_v53, %v803_v47  ;;  %v847_v56 = vpop.f32.mrb[6].mxu0  ;;  %v889_v57 = vpop.f32.mrb[6].mxu1 }
 0x281   : > { %v2360_v58 = vmul.f32 -1.442695, %v893_v52  ;;  %v894_v59 = vadd.f32 %v847_v56, %v805_v48  ;;  %v849_v60 = vpop.f32.mrb[7].mxu0  ;;  %v2622_v61 = vpop.f32.mrb[7].mxu1  ;;  %v922_v31 = vadd.f32 %v3808_v46, %v889_v57 }
 0x282   : > { %v908_v62 = vadd.f32 %v849_v60, %v806_v51  ;;  %v2362_v16 = vmul.f32 -1.442695, %v907_v55  ;;  %v945_v53 = vpop.permute.xlu1 %944 }
 0x283   : > { %2890 = vpow2.f32 %v2360_v58  ;;  %v2361_v63 = vmul.f32 -1.442695, %v894_v59  ;;  %vm949_vm4 = vcmp.eq.s32.totalorder %v945_v53, 1 }
 0x284   : > { %v2363_v19 = vmul.f32 -1.442695, %v908_v62 }
 0x285   : > { %2892 = vpow2.f32 %v2361_v63 }
 0x286   : > { %2894 = vpow2.f32 %v2362_v16  ;;  %v948_v62 = vpop.permute.xlu1 %947 }
 0x287   : > { %2896 = vpow2.f32 %v2363_v19  ;;  %vm950_vm5 = vcmp.eq.s32.totalorder %v948_v62, 1 }
 0x28d   : > { %v2891_v20 = vpop.eup %2890 }
 0x28e   : > { %v901_v22 = vadd.f32 1.0, %v2891_v20 }
 0x28f   : > { %v2893_v23 = vpop.eup %2892 }
 0x290   : > { %2898 = vrcp.f32 %v901_v22  ;;  %v902_v26 = vadd.f32 1.0, %v2893_v23  ;;  %v2895_v28 = vpop.eup %2894 }
 0x291   : > { %v2897_v33 = vpop.eup %2896  ;;  %v915_v35 = vadd.f32 1.0, %v2895_v28 }
 0x292   : > { %2900 = vrcp.f32 %v902_v26  ;;  %v916_v40 = vadd.f32 1.0, %v2897_v33 }
 0x293   : > { %2902 = vrcp.f32 %v915_v35 }
 0x294   : > { %2904 = vrcp.f32 %v916_v40 }
 0x29a   : > { %v2899_v43 = vpop.eup %2898 }
 0x29b   : > { %v923_v44 = vmul.f32 %v2899_v43, %v921_v38 }
 0x29c   : > { %v2901_v45 = vpop.eup %2900 }
 0x29d   : > { %v925_v47 = vadd.f32 %v923_v44, %v804_v37  ;;  %v924_v48 = vmul.f32 %v2901_v45, %v922_v31  ;;  %v2903_v51 = vpop.eup %2902 }
 0x29e   : > { %v2905_v52 = vpop.eup %2904  ;;  %v929_v50 = vsub.f32 1.0, %v2903_v51  ;;  %v933_v56 = vmul.f32 %v2903_v51, %v3821_v41 }
 0x29f   : > { %2906 = vtanh.f32 %v925_v47  ;;  %v926_v49 = vadd.f32 %v924_v48, %v807_v30  ;;  %v930_v58 = vsub.f32 1.0, %v2905_v52  ;;  %v934_v61 = vmul.f32 %v2905_v52, %v3824_v42 }
 0x2a1   : > { %2908 = vtanh.f32 %v926_v49 }
 0x2a9   : > { %v2907_v54 = vpop.eup %2906 }
 0x2aa   : > { %v931_v55 = vmul.f32 %v2907_v54, %v929_v50 }
 0x2ab   : > { %v2909_v59 = vpop.eup %2908 }
 0x2ac   : > { %v935_v57 = vadd.f32 %v933_v56, %v931_v55  ;;  %v932_v60 = vmul.f32 %v2909_v59, %v930_v58  ;;  %v975_v56 = vld [vmem:[%s3921_s26 + $0x8] ss:$12 sps:$4 sm:$0xff]  }
 0x2ad   : > { %v980_v59 = vunpack.c.l.bf16 %v975_v56 }
 0x2ae   : > { %v936_v63 = vadd.f32 %v934_v61, %v932_v60  ;;  %v951_v16 = vsel %vm949_vm4, %v935_v57, 0.0  ;;  %v3877_v19 = vsel %vm949_vm4, %v935_v57, %v3821_v41 }
 0x2b0   : > { %v952_v20 = vsel %vm950_vm5, %v936_v63, 0.0  ;;  %v3880_v22 = vsel %vm950_vm5, %v936_v63, %v3824_v42  ;;  %v983_v63 = vunpack.c.h.bf16 %v975_v56 }
 0x2b1   : > { %v2479_v23 = vpack.c.bf16 %v952_v20, %v951_v16  ;;  %v984_v26 = vpack.c.bf16 %v3880_v22, %v3877_v19 }
 0x2b3   : > { %2480 = vst [vmem:[%s963_s12] sm:$0xff] %v2479_v23   ;;  %1018 = vmatmul.mubr.bf16.vlgmr.msra.gmra.mrb[8].mxu0 %v984_v26  ;;  %2640 = vmatmul.mubr.bf16.vlgmr.msra.gmra.mrb[8].mxu1 %v984_v26 }
 0x2b4   : > { %1162 = vmatpush1.bf16.msra.mxu0 %v3549_v3  ;;  %2644 = vmatpush3.bf16.msra.mxu1 %v3572_v9  ;;  %v974_v3 = vld [vmem:[%s3921_s26] sm:$0xff] }
 0x2b5   : > { %1163 = vmatprep.subr.bf16.mxu0 %v3553_v4  ;;  %2645 = vmatprep.subr.bf16.mxu1 %v3273_v0  ;;  %v976_v4 = vld [vmem:[%s3921_s26 + $0xc] sm:$0xff]  ;;  %v979_v28 = vunpack.c.h.bf16 %v974_v3 }
 0x2b6   : > { %1193 = vmatprep.mubr.bf16.mxu0 %v3274_v1  ;;  %2659 = vmatprep.mubr.msk.bf16.mxu1 %vm3275_vm0, %v3273_v0 }
 0x2b8   : > { %1164 = vmatpush1.bf16.msra.mxu0 %v3557_v5  ;;  %2646 = vmatpush3.bf16.msra.mxu1 %v3588_v12  ;;  %v978_v5 = vunpack.c.l.bf16 %v974_v3 }
 0x2b9   : > { %1165 = vmatprep.subr.bf16.mxu0 %v3561_v6  ;;  %2647 = vmatprep.subr.bf16.mxu1 %v3273_v0  ;;  %v981_v6 = vunpack.c.l.bf16 %v976_v4 }
 0x2bc   : > { %1166 = vmatpush1.bf16.msra.mxu0 %v3565_v7  ;;  %2648 = vmatpush3.bf16.msra.mxu1 %v3599_v14 }
 0x2bd   : > { %1167 = vmatprep.subr.bf16.mxu0 %v3569_v8  ;;  %2649 = vmatprep.subr.bf16.mxu1 %v3273_v0 }
 0x2c0   : > { %1168 = vmatpush1.bf16.msra.mxu0 %v3579_v10  ;;  %2650 = vmatpush3.bf16.msra.mxu1 %v3615_v18 }
 0x2c1   : > { %1169 = vmatprep.subr.bf16.mxu0 %v3584_v11  ;;  %2651 = vmatprep.subr.bf16.mxu1 %v3273_v0 }
 0x2c4   : > { %1170 = vmatpush1.bf16.msra.mxu0 %v3594_v13  ;;  %2652 = vmatpush3.bf16.msra.mxu1 %v3646_v25 }
 0x2c5   : > { %1171 = vmatprep.subr.bf16.mxu0 %v3603_v15  ;;  %2653 = vmatprep.subr.bf16.mxu1 %v3273_v0 }
 0x2c8   : > { %1172 = vmatpush1.bf16.msra.mxu0 %v3608_v17  ;;  %2654 = vmatpush3.bf16.msra.mxu1 %v3674_v32 }
 0x2c9   : > { %1173 = vmatprep.subr.bf16.mxu0 %v3630_v21  ;;  %2655 = vmatprep.subr.bf16.mxu1 %v3273_v0 }
 0x2cc   : > { %1174 = vmatpush1.bf16.msra.mxu0 %v3642_v24  ;;  %2656 = vmatpush3.bf16.msra.mxu1 %v3692_v36 }
 0x2cd   : > { %1175 = vmatprep.subr.bf16.mxu0 %v3652_v27  ;;  %2657 = vmatprep.subr.bf16.mxu1 %v3273_v0 }
 0x2d0   : > { %1176 = vmatpush1.bf16.msra.mxu0 %v3660_v29  ;;  %2658 = vmatpush3.bf16.msra.mxu1 %v3706_v39 }
 0x2d1   : > { %1337 = vmatprep.subr.bf16.mxu0 %v3546_v2  ;;  %2663 = vmatprep.subr.bf16.mxu1 %v3273_v0  ;;  %v982_v2 = vunpack.c.h.bf16 %v976_v4 }
 0x386   : > { %v1019_v41 = vpop.f32.mrb[8].mxu0  ;;  %v1062_v42 = vpop.f32.mrb[8].mxu1 }
 0x387   : > { %v1069_v33 = vadd.f32 %v1019_v41, %v978_v5  ;;  %v1021_v34 = vpop.f32.mrb[9].mxu0  ;;  %v2641_v35 = vpop.f32.mrb[9].mxu1  ;;  %v1097_v57 = vadd.f32 %v3808_v46, %v1062_v42 }
 0x388   : > { %v1023_v37 = vpop.f32.mrb[10].mxu0  ;;  %v1065_v38 = vpop.f32.mrb[10].mxu1  ;;  %v1083_v31 = vadd.f32 %v1021_v34, %v979_v28 }
 0x389   : > { %v2370_v40 = vmul.f32 -1.442695, %v1069_v33  ;;  %v1070_v43 = vadd.f32 %v1023_v37, %v981_v6  ;;  %v1025_v44 = vpop.f32.mrb[11].mxu0  ;;  %v2642_v30 = vpop.f32.mrb[11].mxu1  ;;  %v1098_v16 = vadd.f32 %v3808_v46, %v1065_v38 }
 0x38a   : > { %v1084_v47 = vadd.f32 %v1025_v44, %v982_v2  ;;  %v2372_v48 = vmul.f32 -1.442695, %v1083_v31  ;;  %v1121_v2 = vpop.permute.xlu0 %1120 }
 0x38b   : > { %2910 = vpow2.f32 %v2370_v40  ;;  %v2371_v45 = vmul.f32 -1.442695, %v1070_v43  ;;  %v1124_v40 = vpop.permute.xlu1 %1123  ;;  %vm1125_vm6 = vcmp.eq.s32.totalorder %v1121_v2, 1 }
 0x38c   : > { %v2373_v49 = vmul.f32 -1.442695, %v1084_v47  ;;  %vm1126_vm7 = vcmp.eq.s32.totalorder %v1124_v40, 1 }
 0x38d   : > { %2912 = vpow2.f32 %v2371_v45 }
 0x38e   : > { %2914 = vpow2.f32 %v2372_v48 }
 0x38f   : > { %2916 = vpow2.f32 %v2373_v49  ;;  %v3941_v49 = vld [vmem:[%s3543_s27] ss:$12 sps:$4 sm:$0xff]  }
 0x395   : > { %v2911_v51 = vpop.eup %2910 }
 0x396   : > { %v1077_v52 = vadd.f32 1.0, %v2911_v51  ;;  %v3946_v51 = vld [vmem:[%s3543_s27 + $0x1c] ss:$12 sps:$4 sm:$0xff]  }
 0x397   : > { %v2913_v53 = vpop.eup %2912 }
 0x398   : > { %2918 = vrcp.f32 %v1077_v52  ;;  %v1078_v50 = vadd.f32 1.0, %v2913_v53  ;;  %v2915_v54 = vpop.eup %2914 }
 0x399   : > { %v2917_v55 = vpop.eup %2916  ;;  %v1091_v58 = vadd.f32 1.0, %v2915_v54 }
 0x39a   : > { %2920 = vrcp.f32 %v1078_v50  ;;  %v1092_v60 = vadd.f32 1.0, %v2917_v55 }
 0x39b   : > { %2922 = vrcp.f32 %v1091_v58 }
 0x39c   : > { %2924 = vrcp.f32 %v1092_v60 }
 0x3a2   : > { %v2919_v61 = vpop.eup %2918 }
 0x3a3   : > { %v1099_v62 = vmul.f32 %v2919_v61, %v1097_v57  ;;  %v1151_v61 = vld [vmem:[%s3992_s28 + $0x8] ss:$12 sps:$4 sm:$0xff]  }
 0x3a4   : > { %v2921_v20 = vpop.eup %2920 }
 0x3a5   : > { %v1101_v23 = vadd.f32 %v1099_v62, %v980_v59  ;;  %v1100_v26 = vmul.f32 %v2921_v20, %v1098_v16  ;;  %v2923_v4 = vpop.eup %2922 }
 0x3a6   : > { %v2925_v5 = vpop.eup %2924  ;;  %v1105_v6 = vsub.f32 1.0, %v2923_v4  ;;  %v1109_v42 = vmul.f32 %v2923_v4, %v3877_v19 }
 0x3a7   : > { %2926 = vtanh.f32 %v1101_v23  ;;  %v1102_v3 = vadd.f32 %v1100_v26, %v983_v63  ;;  %v1106_v28 = vsub.f32 1.0, %v2925_v5  ;;  %v1110_v35 = vmul.f32 %v2925_v5, %v3880_v22 }
 0x3a8   : > { %v1156_v63 = vunpack.c.l.bf16 %v1151_v61 }
 0x3a9   : > { %2928 = vtanh.f32 %v1102_v3  ;;  %v1159_v3 = vunpack.c.h.bf16 %v1151_v61 }
 0x3b1   : > { %v2927_v41 = vpop.eup %2926 }
 0x3b2   : > { %v1107_v33 = vmul.f32 %v2927_v41, %v1105_v6 }
 0x3b3   : > { %v2929_v34 = vpop.eup %2928 }
 0x3b4   : > { %v1108_v37 = vmul.f32 %v2929_v34, %v1106_v28  ;;  %v1111_v38 = vadd.f32 %v1109_v42, %v1107_v33 }
 0x3b6   : > { %v1112_v43 = vadd.f32 %v1110_v35, %v1108_v37  ;;  %v1127_v44 = vsel %vm1125_vm6, %v1111_v38, 0.0  ;;  %v3933_v31 = vsel %vm1125_vm6, %v1111_v38, %v3877_v19  ;;  %v3954_v19 = vld [vmem:[%s3543_s27 + $0x18] ss:$12 sps:$4 sm:$0xff]  }
 0x3b8   : > { %v1128_v30 = vsel %vm1126_vm7, %v1112_v43, 0.0  ;;  %v3936_v45 = vsel %vm1126_vm7, %v1112_v43, %v3880_v22  ;;  %v3959_v22 = vld [vmem:[%s3543_s27 + $0x34] ss:$12 sps:$4 sm:$0xff]  }
 0x3b9   : > { %v2484_v47 = vpack.c.bf16 %v1128_v30, %v1127_v44  ;;  %v1160_v48 = vpack.c.bf16 %v3936_v45, %v3933_v31 }
 0x3bb   : > { %2485 = vst [vmem:[%s1139_s17] sm:$0xff] %v2484_v47   ;;  %1194 = vmatmul.mubr.bf16.vlgmr.msra.gmra.mrb[12].mxu0 %v1160_v48  ;;  %2660 = vmatmul.mubr.bf16.vlgmr.msra.gmra.mrb[12].mxu1 %v1160_v48  ;;  %v1297_v47 = vpop.permute.xlu0 %1296  ;;  %v1300_v48 = vpop.permute.xlu1 %1299  ;;  %s2464_s17 = sshll.u32 %s3702_s11, 3 }
 0x3bc   : > { %1338 = vmatpush1.bf16.msra.mxu0 %v3941_v49  ;;  %2664 = vmatpush3.bf16.msra.mxu1 %v3572_v9  ;;  %v1152_v9 = vld [vmem:[%s3992_s28 + $0xc] sm:$0xff]  ;;  %vm1301_vm8 = vcmp.eq.s32.totalorder %v1297_v47, 1  ;;  %vm1302_vm9 = vcmp.eq.s32.totalorder %v1300_v48, 1  ;;  %v1327_v47 = vld [vmem:[%s4105_s2 + $0x8] ss:$12 sps:$4 sm:$0xff]   ;;  %s1842_s20 = scalar_lea.vmem %s3817_s13, %s2464_s17 [#allocation9] }
 0x3bd   : > { %1339 = vmatprep.subr.bf16.mxu0 %v3946_v51  ;;  %2665 = vmatprep.subr.bf16.mxu1 %v3273_v0 }
 0x3be   : > { %1369 = vmatprep.mubr.bf16.mxu0 %v3274_v1  ;;  %2679 = vmatprep.mubr.msk.bf16.mxu1 %vm3275_vm0, %v3273_v0 }
 0x3c0   : > { %1340 = vmatpush1.bf16.msra.mxu0 %v3954_v19  ;;  %2666 = vmatpush3.bf16.msra.mxu1 %v3588_v12 }
 0x3c1   : > { %1341 = vmatprep.subr.bf16.mxu0 %v3959_v22  ;;  %2667 = vmatprep.subr.bf16.mxu1 %v3273_v0 }
 0x3c4   : > { %1342 = vmatpush1.bf16.msra.mxu0 %v3565_v7  ;;  %2668 = vmatpush3.bf16.msra.mxu1 %v3599_v14  ;;  %v3986_v7 = vld [vmem:[%s3543_s27 + $0x4] ss:$12 sps:$4 sm:$0xff]  }
 0x3c5   : > { %1343 = vmatprep.subr.bf16.mxu0 %v3569_v8  ;;  %2669 = vmatprep.subr.bf16.mxu1 %v3273_v0  ;;  %v1150_v8 = vld [vmem:[%s3992_s28] sm:$0xff] }
 0x3c6   : > { %v1155_v14 = vunpack.c.h.bf16 %v1150_v8 }
 0x3c8   : > { %1344 = vmatpush1.bf16.msra.mxu0 %v3579_v10  ;;  %2670 = vmatpush3.bf16.msra.mxu1 %v3615_v18  ;;  %v1154_v10 = vunpack.c.l.bf16 %v1150_v8 }
 0x3c9   : > { %1345 = vmatprep.subr.bf16.mxu0 %v3584_v11  ;;  %2671 = vmatprep.subr.bf16.mxu1 %v3273_v0  ;;  %v1157_v11 = vunpack.c.l.bf16 %v1152_v9 }
 0x3cc   : > { %1346 = vmatpush1.bf16.msra.mxu0 %v3594_v13  ;;  %2672 = vmatpush3.bf16.msra.mxu1 %v3646_v25  ;;  %v1158_v25 = vunpack.c.h.bf16 %v1152_v9 }
 0x3cd   : > { %1347 = vmatprep.subr.bf16.mxu0 %v3603_v15  ;;  %2673 = vmatprep.subr.bf16.mxu1 %v3273_v0 }
 0x3d0   : > { %1348 = vmatpush1.bf16.msra.mxu0 %v3608_v17  ;;  %2674 = vmatpush3.bf16.msra.mxu1 %v3674_v32 }
 0x3d1   : > { %1349 = vmatprep.subr.bf16.mxu0 %v3630_v21  ;;  %2675 = vmatprep.subr.bf16.mxu1 %v3273_v0 }
 0x3d4   : > { %1350 = vmatpush1.bf16.msra.mxu0 %v3642_v24  ;;  %2676 = vmatpush3.bf16.msra.mxu1 %v3692_v36 }
 0x3d5   : > { %1351 = vmatprep.subr.bf16.mxu0 %v3652_v27  ;;  %2677 = vmatprep.subr.bf16.mxu1 %v3273_v0 }
 0x3d8   : > { %1352 = vmatpush1.bf16.msra.mxu0 %v3660_v29  ;;  %2678 = vmatpush3.bf16.msra.mxu1 %v3706_v39 }
 0x3d9   : > { %1513 = vmatprep.subr.bf16.mxu0 %v3986_v7  ;;  %2683 = vmatprep.subr.bf16.mxu1 %v3273_v0 }
 0x48e   : > { %v1195_v12 = vpop.f32.mrb[12].mxu0  ;;  %v1238_v13 = vpop.f32.mrb[12].mxu1 }
 0x48f   : > { %v1245_v15 = vadd.f32 %v1195_v12, %v1154_v10  ;;  %v1197_v17 = vpop.f32.mrb[13].mxu0  ;;  %v2661_v18 = vpop.f32.mrb[13].mxu1  ;;  %v1273_v16 = vadd.f32 %v3808_v46, %v1238_v13 }
 0x490   : > { %v1199_v21 = vpop.f32.mrb[14].mxu0  ;;  %v1241_v24 = vpop.f32.mrb[14].mxu1  ;;  %v1259_v39 = vadd.f32 %v1197_v17, %v1155_v14  ;;  %v4033_v17 = vld [vmem:[%s3543_s27 + $0x38] ss:$12 sps:$4 sm:$0xff]  }
 0x491   : > { %v2380_v27 = vmul.f32 -1.442695, %v1245_v15  ;;  %v1246_v29 = vadd.f32 %v1199_v21, %v1157_v11  ;;  %v1201_v32 = vpop.f32.mrb[15].mxu0  ;;  %v2662_v36 = vpop.f32.mrb[15].mxu1  ;;  %v1274_v4 = vadd.f32 %v3808_v46, %v1241_v24  ;;  %v4013_v15 = vld [vmem:[%s3543_s27 + $0x8] ss:$12 sps:$4 sm:$0xff]  }
 0x492   : > { %v1260_v53 = vadd.f32 %v1201_v32, %v1158_v25  ;;  %v2382_v50 = vmul.f32 -1.442695, %v1259_v39  ;;  %v4037_v18 = vld [vmem:[%s3543_s27 + $0x4c] ss:$12 sps:$4 sm:$0xff]   ;;  %v4042_v21 = vld [vmem:[%s3543_s27 + $0x48] ss:$12 sps:$4 sm:$0xff]  }
 0x493   : > { %2930 = vpow2.f32 %v2380_v27  ;;  %v2381_v52 = vmul.f32 -1.442695, %v1246_v29  ;;  %v4046_v24 = vld [vmem:[%s3543_s27 + $0x50] ss:$12 sps:$4 sm:$0xff]   ;;  %v4055_v27 = vld [vmem:[%s3543_s27 + $0x60] ss:$12 sps:$4 sm:$0xff]  }
 0x494   : > { %v2383_v54 = vmul.f32 -1.442695, %v1260_v53  ;;  %v4050_v25 = vld [vmem:[%s3543_s27 + $0x64] ss:$12 sps:$4 sm:$0xff]   ;;  %v4059_v29 = vld [vmem:[%s3543_s27 + $0x68] ss:$12 sps:$4 sm:$0xff]  }
 0x495   : > { %2932 = vpow2.f32 %v2381_v52  ;;  %v4063_v32 = vld [vmem:[%s3543_s27 + $0x7c] ss:$12 sps:$4 sm:$0xff]   ;;  %v4068_v36 = vld [vmem:[%s3543_s27 + $0x78] ss:$12 sps:$4 sm:$0xff]   ;;  %v4072_v39 = vld [vmem:[%s3543_s27 + $0x80] ss:$12 sps:$4 sm:$0xff]  }
 0x496   : > { %2934 = vpow2.f32 %v2382_v50  ;;  %v4076_v52 = vld [vmem:[%s3543_s27 + $0x94] ss:$12 sps:$4 sm:$0xff]   ;;  %v4081_v53 = vld [vmem:[%s3543_s27 + $0x90] ss:$12 sps:$4 sm:$0xff]   ;;  %v4085_v50 = vld [vmem:[%s3543_s27 + $0x98] ss:$12 sps:$4 sm:$0xff]  }
 0x497   : > { %2936 = vpow2.f32 %v2383_v54  ;;  %v4089_v54 = vld [vmem:[%s3543_s27 + $0xac] ss:$12 sps:$4 sm:$0xff]  }
 0x49d   : > { %v2931_v55 = vpop.eup %2930 }
 0x49e   : > { %v1253_v56 = vadd.f32 1.0, %v2931_v55  ;;  %v4094_v55 = vld [vmem:[%s3543_s27 + $0xa8] ss:$12 sps:$4 sm:$0xff]  }
 0x49f   : > { %v2933_v58 = vpop.eup %2932 }
 0x4a0   : > { %2938 = vrcp.f32 %v1253_v56  ;;  %v1254_v59 = vadd.f32 1.0, %v2933_v58  ;;  %v2935_v57 = vpop.eup %2934  ;;  %v4098_v56 = vld [vmem:[%s3543_s27 + $0xb0] ss:$12 sps:$4 sm:$0xff]   ;;  %v1326_v58 = vld [vmem:[%s4105_s2] sm:$0xff] }
 0x4a1   : > { %v2937_v60 = vpop.eup %2936  ;;  %v1267_v62 = vadd.f32 1.0, %v2935_v57  ;;  %v1330_v57 = vunpack.c.l.bf16 %v1326_v58 }
 0x4a2   : > { %2940 = vrcp.f32 %v1254_v59  ;;  %v1268_v20 = vadd.f32 1.0, %v2937_v60  ;;  %v1328_v59 = vld [vmem:[%s4105_s2 + $0xc] sm:$0xff]  ;;  %s2068_s2 = sshll.u32 %s412_s15, 4  ;;  %s4263_s2 = int_to_ptr.vmem [resolvable:$true] %s2068_s2 }
 0x4a3   : > { %2942 = vrcp.f32 %v1267_v62  ;;  %v1333_v60 = vunpack.c.l.bf16 %v1328_v59 }
 0x4a4   : > { %2944 = vrcp.f32 %v1268_v20 }
 0x4aa   : > { %v2939_v23 = vpop.eup %2938 }
 0x4ab   : > { %v1275_v26 = vmul.f32 %v2939_v23, %v1273_v16 }
 0x4ac   : > { %v2941_v5 = vpop.eup %2940 }
 0x4ad   : > { %v1277_v6 = vadd.f32 %v1275_v26, %v1156_v63  ;;  %v1276_v41 = vmul.f32 %v2941_v5, %v1274_v4  ;;  %v2943_v28 = vpop.eup %2942  ;;  %v1331_v63 = vunpack.c.h.bf16 %v1326_v58  ;;  %v1334_v4 = vunpack.c.h.bf16 %v1328_v59 }
 0x4ae   : > { %v2945_v33 = vpop.eup %2944  ;;  %v1281_v34 = vsub.f32 1.0, %v2943_v28  ;;  %v1285_v37 = vmul.f32 %v2943_v28, %v3933_v31  ;;  %v1335_v58 = vunpack.c.h.bf16 %v1327_v47 }
 0x4af   : > { %2946 = vtanh.f32 %v1277_v6  ;;  %v1278_v42 = vadd.f32 %v1276_v41, %v1159_v3  ;;  %v1282_v38 = vsub.f32 1.0, %v2945_v33  ;;  %v1286_v43 = vmul.f32 %v2945_v33, %v3936_v45 }
 0x4b1   : > { %2948 = vtanh.f32 %v1278_v42 }
 0x4b9   : > { %v2947_v35 = vpop.eup %2946 }
 0x4ba   : > { %v1283_v2 = vmul.f32 %v2947_v35, %v1281_v34 }
 0x4bb   : > { %v2949_v40 = vpop.eup %2948 }
 0x4bc   : > { %v1284_v44 = vmul.f32 %v2949_v40, %v1282_v38  ;;  %v1287_v30 = vadd.f32 %v1285_v37, %v1283_v2 }
 0x4be   : > { %v1288_v8 = vadd.f32 %v1286_v43, %v1284_v44  ;;  %v1303_v9 = vsel %vm1301_vm8, %v1287_v30, 0.0  ;;  %v4004_v11 = vsel %vm1301_vm8, %v1287_v30, %v3933_v31  ;;  %v4023_v31 = vld [vmem:[%s3543_s27 + $0x20] ss:$12 sps:$4 sm:$0xff]  }
 0x4c0   : > { %v1304_v10 = vsel %vm1302_vm9, %v1288_v8, 0.0  ;;  %v4007_v12 = vsel %vm1302_vm9, %v1288_v8, %v3936_v45  ;;  %v4029_v45 = vld [vmem:[%s3543_s27 + $0x30] ss:$12 sps:$4 sm:$0xff]   ;;  %v1332_v8 = vunpack.c.l.bf16 %v1327_v47  ;;  %s2456_s27 = sshll.u32 %s3662_s1, 3  ;;  %s2457_s1 = smul.u32 24, %s3686_s30 }
 0x4c1   : > { %v2489_v13 = vpack.c.bf16 %v1304_v10, %v1303_v9  ;;  %v1336_v14 = vpack.c.bf16 %v4007_v12, %v4004_v11  ;;  %s1491_s12 = scalar_lea.vmem %s3817_s13, %s2456_s27 [#allocation9]  ;;  %s2052_s27 = sshll.u32 %s3817_s13, 4  ;;  %s4270_s27 = int_to_ptr.vmem [resolvable:$true] %s2052_s27 }
 0x4c2   : > { %s4161_s8 = scalar_lea.vmem %s3521_s23, %s2457_s1 [#allocation3] }
 0x4c3   : > { %2490 = vst [vmem:[%s1315_s19] sm:$0xff] %v2489_v13   ;;  %1370 = vmatmul.mubr.bf16.vlgmr.msra.gmra.mrb[16].mxu0 %v1336_v14  ;;  %2680 = vmatmul.mubr.bf16.vlgmr.msra.gmra.mrb[16].mxu1 %v1336_v14  ;;  %s2470_s19 = sshll.u32 %s3255_s24, 8 }
 0x4c4   : > { %1514 = vmatpush1.bf16.msra.mxu0 %v3941_v49  ;;  %2684 = vmatpush3.bf16.msra.mxu1 %v4013_v15 }
 0x4c5   : > { %1515 = vmatprep.subr.bf16.mxu0 %v3946_v51  ;;  %2685 = vmatprep.subr.bf16.mxu1 %v3273_v0 }
 0x4c6   : > { %1545 = vmatprep.mubr.bf16.mxu0 %v3274_v1  ;;  %2699 = vmatprep.mubr.msk.bf16.mxu1 %vm3275_vm0, %v3273_v0 }
 0x4c8   : > { %1516 = vmatpush1.bf16.msra.mxu0 %v3954_v19  ;;  %2686 = vmatpush3.bf16.msra.mxu1 %v4023_v31 }
 0x4c9   : > { %1517 = vmatprep.subr.bf16.mxu0 %v3959_v22  ;;  %2687 = vmatprep.subr.bf16.mxu1 %v3273_v0 }
 0x4cc   : > { %1518 = vmatpush1.bf16.msra.mxu0 %v4029_v45  ;;  %2688 = vmatpush3.bf16.msra.mxu1 %v4033_v17 }
 0x4cd   : > { %1519 = vmatprep.subr.bf16.mxu0 %v4037_v18  ;;  %2689 = vmatprep.subr.bf16.mxu1 %v3273_v0 }
 0x4d0   : > { %1520 = vmatpush1.bf16.msra.mxu0 %v4042_v21  ;;  %2690 = vmatpush3.bf16.msra.mxu1 %v4046_v24 }
 0x4d1   : > { %1521 = vmatprep.subr.bf16.mxu0 %v4050_v25  ;;  %2691 = vmatprep.subr.bf16.mxu1 %v3273_v0 }
 0x4d4   : > { %1522 = vmatpush1.bf16.msra.mxu0 %v4055_v27  ;;  %2692 = vmatpush3.bf16.msra.mxu1 %v4059_v29 }
 0x4d5   : > { %1523 = vmatprep.subr.bf16.mxu0 %v4063_v32  ;;  %2693 = vmatprep.subr.bf16.mxu1 %v3273_v0 }
 0x4d8   : > { %1524 = vmatpush1.bf16.msra.mxu0 %v4068_v36  ;;  %2694 = vmatpush3.bf16.msra.mxu1 %v4072_v39 }
 0x4d9   : > { %1525 = vmatprep.subr.bf16.mxu0 %v4076_v52  ;;  %2695 = vmatprep.subr.bf16.mxu1 %v3273_v0 }
 0x4dc   : > { %1526 = vmatpush1.bf16.msra.mxu0 %v4081_v53  ;;  %2696 = vmatpush3.bf16.msra.mxu1 %v4085_v50 }
 0x4dd   : > { %1527 = vmatprep.subr.bf16.mxu0 %v4089_v54  ;;  %2697 = vmatprep.subr.bf16.mxu1 %v3273_v0 }
 0x4e0   : > { %1528 = vmatpush1.bf16.msra.mxu0 %v4094_v55  ;;  %2698 = vmatpush3.bf16.msra.mxu1 %v4098_v56 }
 0x4e1   : > { %1688 = vmatprep.subr.bf16.mxu0 %v3986_v7  ;;  %2703 = vmatprep.subr.bf16.mxu1 %v3273_v0 }
 0x596   : > { %v1371_v61 = vpop.f32.mrb[16].mxu0  ;;  %v1414_v62 = vpop.f32.mrb[16].mxu1 }
 0x597   : > { %v1421_v16 = vadd.f32 %v1371_v61, %v1330_v57  ;;  %v1373_v20 = vpop.f32.mrb[17].mxu0  ;;  %v2681_v23 = vpop.f32.mrb[17].mxu1  ;;  %v1449_v9 = vadd.f32 %v3808_v46, %v1414_v62 }
 0x598   : > { %v1375_v26 = vpop.f32.mrb[18].mxu0  ;;  %v1417_v3 = vpop.f32.mrb[18].mxu1  ;;  %v1435_v28 = vadd.f32 %v1373_v20, %v1331_v63 }
 0x599   : > { %v2390_v5 = vmul.f32 -1.442695, %v1421_v16  ;;  %v1422_v6 = vadd.f32 %v1375_v26, %v1333_v60  ;;  %v1377_v41 = vpop.f32.mrb[19].mxu0  ;;  %v2682_v42 = vpop.f32.mrb[19].mxu1  ;;  %v1450_v59 = vadd.f32 %v3808_v46, %v1417_v3 }
 0x59a   : > { %v1436_v34 = vadd.f32 %v1377_v41, %v1334_v4  ;;  %v2392_v35 = vmul.f32 -1.442695, %v1435_v28  ;;  %v1473_v42 = vpop.permute.xlu0 %1472  ;;  %v1476_v28 = vpop.permute.xlu1 %1475 }
 0x59b   : > { %2950 = vpow2.f32 %v2390_v5  ;;  %v2391_v33 = vmul.f32 -1.442695, %v1422_v6  ;;  %vm1477_vm10 = vcmp.eq.s32.totalorder %v1473_v42, 1  ;;  %vm1478_vm11 = vcmp.eq.s32.totalorder %v1476_v28, 1  ;;  %v4167_v28 = vld [vmem:[%s3805_s7] ss:$0 sm:$0xff] }
 0x59c   : > { %v2393_v37 = vmul.f32 -1.442695, %v1436_v34  ;;  %s2460_s7 = sshll.u32 %s3686_s30, 3  ;;  %s2461_s30 = smul.u32 24, %s3702_s11 }
 0x59d   : > { %2952 = vpow2.f32 %v2391_v33  ;;  %s1667_s26 = scalar_lea.vmem %s3817_s13, %s2460_s7 [#allocation9]  ;;  %s2465_s11 = smul.u32 168, %s3575_s9 }
 0x59e   : > { %2954 = vpow2.f32 %v2392_v35  ;;  %s4218_s14 = scalar_lea.vmem %s3521_s23, %s2461_s30 [#allocation3]  ;;  %s2031_s7 = scalar_lea.sflag [#allocation11], %s3517_s29 }
 0x59f   : > { %2956 = vpow2.f32 %v2393_v37  ;;  %s4239_s28 = scalar_lea.vmem %s3521_s23, %s2465_s11 [#allocation3]  ;;  %s2468_s23 = smul.u32 56, %s3575_s9 }
 0x5a0   : > { %s2469_s9 = sshll.u32 %s3255_s24, 10  ;;  %s3276_s30 = smov [#allocation10]  }
 0x5a1   : > { %s4248_s18 = scalar_lea.vmem %s3817_s13, %s2468_s23 [#allocation9]  ;;  %s4268_s13 = scalar_lea.hbm %s4350_s5, %s2469_s9 }
 0x5a5   : > { %v2951_v38 = vpop.eup %2950 }
 0x5a6   : > { %v1429_v2 = vadd.f32 1.0, %v2951_v38 }
 0x5a7   : > { %v2953_v40 = vpop.eup %2952 }
 0x5a8   : > { %2958 = vrcp.f32 %v1429_v2  ;;  %v1430_v43 = vadd.f32 1.0, %v2953_v40  ;;  %v2955_v44 = vpop.eup %2954 }
 0x5a9   : > { %v2957_v30 = vpop.eup %2956  ;;  %v1443_v48 = vadd.f32 1.0, %v2955_v44 }
 0x5aa   : > { %2960 = vrcp.f32 %v1430_v43  ;;  %v1444_v10 = vadd.f32 1.0, %v2957_v30 }
 0x5ab   : > { %2962 = vrcp.f32 %v1443_v48 }
 0x5ac   : > { %2964 = vrcp.f32 %v1444_v10 }
 0x5b2   : > { %v2959_v13 = vpop.eup %2958 }
 0x5b3   : > { %v1451_v14 = vmul.f32 %v2959_v13, %v1449_v9 }
 0x5b4   : > { %v2961_v57 = vpop.eup %2960 }
 0x5b5   : > { %v1453_v60 = vadd.f32 %v1451_v14, %v1332_v8  ;;  %v1452_v61 = vmul.f32 %v2961_v57, %v1450_v59  ;;  %v2963_v16 = vpop.eup %2962 }
 0x5b6   : > { %v2965_v20 = vpop.eup %2964  ;;  %v1457_v23 = vsub.f32 1.0, %v2963_v16  ;;  %v1461_v26 = vmul.f32 %v2963_v16, %v4004_v11 }
 0x5b7   : > { %2966 = vtanh.f32 %v1453_v60  ;;  %v1454_v63 = vadd.f32 %v1452_v61, %v1335_v58  ;;  %v1458_v4 = vsub.f32 1.0, %v2965_v20  ;;  %v1462_v46 = vmul.f32 %v2965_v20, %v4007_v12 }
 0x5b9   : > { %2968 = vtanh.f32 %v1454_v63 }
 0x5c1   : > { %v2967_v62 = vpop.eup %2966 }
 0x5c2   : > { %v1459_v5 = vmul.f32 %v2967_v62, %v1457_v23 }
 0x5c3   : > { %v2969_v6 = vpop.eup %2968 }
 0x5c4   : > { %v1460_v3 = vmul.f32 %v2969_v6, %v1458_v4  ;;  %v1463_v41 = vadd.f32 %v1461_v26, %v1459_v5 }
 0x5c6   : > { %v1464_v33 = vadd.f32 %v1462_v46, %v1460_v3  ;;  %v1479_v34 = vsel %vm1477_vm10, %v1463_v41, 0.0  ;;  %v4117_v37 = vsel %vm1477_vm10, %v1463_v41, %v4004_v11  ;;  %v1502_v11 = vld [vmem:[%s4161_s8] sm:$0xff]  ;;  %v1503_v3 = vld [vmem:[%s4161_s8 + $0x8] ss:$12 sps:$4 sm:$0xff]  }
 0x5c7   : > { %v1506_v43 = vunpack.c.l.bf16 %v1502_v11  ;;  %v1507_v48 = vunpack.c.h.bf16 %v1502_v11  ;;  %v1508_v42 = vunpack.c.l.bf16 %v1503_v3 }
 0x5c8   : > { %v1480_v35 = vsel %vm1478_vm11, %v1464_v33, 0.0  ;;  %v4120_v38 = vsel %vm1478_vm11, %v1464_v33, %v4007_v12  ;;  %v1504_v12 = vld [vmem:[%s4161_s8 + $0xc] sm:$0xff]  ;;  %s4261_s8 = scalar_lea.hbm %s4351_s6, %s2470_s19 }
 0x5c9   : > { %v2494_v2 = vpack.c.bf16 %v1480_v35, %v1479_v34  ;;  %v1512_v40 = vpack.c.bf16 %v4120_v38, %v4117_v37  ;;  %v1509_v44 = vunpack.c.l.bf16 %v1504_v12 }
 0x5cb   : > { %2495 = vst [vmem:[%s1491_s12] sm:$0xff] %v2494_v2   ;;  %1546 = vmatmul.mubr.bf16.vlgmr.msra.gmra.mrb[20].mxu0 %v1512_v40  ;;  %2700 = vmatmul.mubr.bf16.vlgmr.msra.gmra.mrb[20].mxu1 %v1512_v40  ;;  %v1511_v40 = vunpack.c.h.bf16 %v1503_v3 }
 0x5cc   : > { %1689 = vmatpush1.bf16.msra.mxu0 %v3941_v49  ;;  %2704 = vmatpush3.bf16.msra.mxu1 %v4013_v15 }
 0x5cd   : > { %1690 = vmatprep.subr.bf16.mxu0 %v3946_v51  ;;  %2705 = vmatprep.subr.bf16.mxu1 %v3273_v0 }
 0x5ce   : > { %1720 = vmatprep.mubr.bf16.mxu0 %v3274_v1  ;;  %2719 = vmatprep.mubr.msk.bf16.mxu1 %vm3275_vm0, %v3273_v0 }
 0x5d0   : > { %1691 = vmatpush1.bf16.msra.mxu0 %v3954_v19  ;;  %2706 = vmatpush3.bf16.msra.mxu1 %v4023_v31 }
 0x5d1   : > { %1692 = vmatprep.subr.bf16.mxu0 %v3959_v22  ;;  %2707 = vmatprep.subr.bf16.mxu1 %v3273_v0 }
 0x5d4   : > { %1693 = vmatpush1.bf16.msra.mxu0 %v4029_v45  ;;  %2708 = vmatpush3.bf16.msra.mxu1 %v4033_v17 }
 0x5d5   : > { %1694 = vmatprep.subr.bf16.mxu0 %v4037_v18  ;;  %2709 = vmatprep.subr.bf16.mxu1 %v3273_v0 }
 0x5d8   : > { %1695 = vmatpush1.bf16.msra.mxu0 %v4042_v21  ;;  %2710 = vmatpush3.bf16.msra.mxu1 %v4046_v24 }
 0x5d9   : > { %1696 = vmatprep.subr.bf16.mxu0 %v4050_v25  ;;  %2711 = vmatprep.subr.bf16.mxu1 %v3273_v0 }
 0x5dc   : > { %1697 = vmatpush1.bf16.msra.mxu0 %v4055_v27  ;;  %2712 = vmatpush3.bf16.msra.mxu1 %v4059_v29 }
 0x5dd   : > { %1698 = vmatprep.subr.bf16.mxu0 %v4063_v32  ;;  %2713 = vmatprep.subr.bf16.mxu1 %v3273_v0 }
 0x5e0   : > { %1699 = vmatpush1.bf16.msra.mxu0 %v4068_v36  ;;  %2714 = vmatpush3.bf16.msra.mxu1 %v4072_v39 }
 0x5e1   : > { %1700 = vmatprep.subr.bf16.mxu0 %v4076_v52  ;;  %2715 = vmatprep.subr.bf16.mxu1 %v3273_v0 }
 0x5e4   : > { %1701 = vmatpush1.bf16.msra.mxu0 %v4081_v53  ;;  %2716 = vmatpush3.bf16.msra.mxu1 %v4085_v50 }
 0x5e5   : > { %1702 = vmatprep.subr.bf16.mxu0 %v4089_v54  ;;  %2717 = vmatprep.subr.bf16.mxu1 %v3273_v0 }
 0x5e8   : > { %1703 = vmatpush1.bf16.msra.mxu0 %v4094_v55  ;;  %2718 = vmatpush3.bf16.msra.mxu1 %v4098_v56 }
 0x5e9   : > { %1862 = vmatprep.subr.bf16.mxu0 %v3986_v7  ;;  %2723 = vmatprep.subr.bf16.mxu1 %v3273_v0  ;;  %v1510_v7 = vunpack.c.h.bf16 %v1504_v12 }
 0x69e   : > { %v1547_v30 = vpop.f32.mrb[20].mxu0  ;;  %v1590_v47 = vpop.f32.mrb[20].mxu1 }
 0x69f   : > { %v1597_v8 = vadd.f32 %v1547_v30, %v1506_v43  ;;  %v1549_v9 = vpop.f32.mrb[21].mxu0  ;;  %v2701_v10 = vpop.f32.mrb[21].mxu1  ;;  %v1625_v33 = vadd.f32 %v4167_v28, %v1590_v47 }
 0x6a0   : > { %v1551_v13 = vpop.f32.mrb[22].mxu0  ;;  %v1593_v14 = vpop.f32.mrb[22].mxu1  ;;  %v1611_v61 = vadd.f32 %v1549_v9, %v1507_v48 }
 0x6a1   : > { %v2400_v58 = vmul.f32 -1.442695, %v1597_v8  ;;  %v1598_v59 = vadd.f32 %v1551_v13, %v1509_v44  ;;  %v1553_v57 = vpop.f32.mrb[23].mxu0  ;;  %v2702_v60 = vpop.f32.mrb[23].mxu1  ;;  %v1626_v11 = vadd.f32 %v4167_v28, %v1593_v14 }
 0x6a2   : > { %v1612_v16 = vadd.f32 %v1553_v57, %v1510_v7  ;;  %v2402_v20 = vmul.f32 -1.442695, %v1611_v61  ;;  %v1649_v60 = vpop.permute.xlu0 %1648  ;;  %v1652_v61 = vpop.permute.xlu1 %1651 }
 0x6a3   : > { %2970 = vpow2.f32 %v2400_v58  ;;  %v2401_v63 = vmul.f32 -1.442695, %v1598_v59  ;;  %vm1653_vm12 = vcmp.eq.s32.totalorder %v1649_v60, 1  ;;  %vm1654_vm13 = vcmp.eq.s32.totalorder %v1652_v61, 1 }
 0x6a4   : > { %v2403_v23 = vmul.f32 -1.442695, %v1612_v16 }
 0x6a5   : > { %2972 = vpow2.f32 %v2401_v63 }
 0x6a6   : > { %2974 = vpow2.f32 %v2402_v20 }
 0x6a7   : > { %2976 = vpow2.f32 %v2403_v23 }
 0x6ad   : > { %v2971_v62 = vpop.eup %2970 }
 0x6ae   : > { %v1605_v26 = vadd.f32 1.0, %v2971_v62 }
 0x6af   : > { %v2973_v4 = vpop.eup %2972 }
 0x6b0   : > { %2978 = vrcp.f32 %v1605_v26  ;;  %v1606_v5 = vadd.f32 1.0, %v2973_v4  ;;  %v2975_v6 = vpop.eup %2974 }
 0x6b1   : > { %v2977_v46 = vpop.eup %2976  ;;  %v1619_v41 = vadd.f32 1.0, %v2975_v6  ;;  %v1678_v6 = vld [vmem:[%s4218_s14 + $0x8] ss:$12 sps:$4 sm:$0xff]  }
 0x6b2   : > { %2980 = vrcp.f32 %v1606_v5  ;;  %v1620_v34 = vadd.f32 1.0, %v2977_v46  ;;  %v1683_v3 = vunpack.c.l.bf16 %v1678_v6 }
 0x6b3   : > { %2982 = vrcp.f32 %v1619_v41 }
 0x6b4   : > { %2984 = vrcp.f32 %v1620_v34 }
 0x6ba   : > { %v2979_v35 = vpop.eup %2978 }
 0x6bb   : > { %v1627_v2 = vmul.f32 %v2979_v35, %v1625_v33  ;;  %v1686_v35 = vunpack.c.h.bf16 %v1678_v6 }
 0x6bc   : > { %v2981_v12 = vpop.eup %2980 }
 0x6bd   : > { %v1629_v43 = vadd.f32 %v1627_v2, %v1508_v42  ;;  %v1628_v44 = vmul.f32 %v2981_v12, %v1626_v11  ;;  %v2983_v48 = vpop.eup %2982 }
 0x6be   : > { %v2985_v8 = vpop.eup %2984  ;;  %v1633_v9 = vsub.f32 1.0, %v2983_v48  ;;  %v1637_v10 = vmul.f32 %v2983_v48, %v4117_v37 }
 0x6bf   : > { %2986 = vtanh.f32 %v1629_v43  ;;  %v1630_v30 = vadd.f32 %v1628_v44, %v1511_v40  ;;  %v1634_v13 = vsub.f32 1.0, %v2985_v8  ;;  %v1638_v14 = vmul.f32 %v2985_v8, %v4120_v38 }
 0x6c1   : > { %2988 = vtanh.f32 %v1630_v30 }
 0x6c9   : > { %v2987_v47 = vpop.eup %2986 }
 0x6ca   : > { %v1635_v7 = vmul.f32 %v2987_v47, %v1633_v9 }
 0x6cb   : > { %v2989_v58 = vpop.eup %2988 }
 0x6cc   : > { %v1636_v59 = vmul.f32 %v2989_v58, %v1634_v13  ;;  %v1639_v57 = vadd.f32 %v1637_v10, %v1635_v7 }
 0x6ce   : > { %v1640_v63 = vadd.f32 %v1638_v14, %v1636_v59  ;;  %v1655_v16 = vsel %vm1653_vm12, %v1639_v57, 0.0  ;;  %v4176_v23 = vsel %vm1653_vm12, %v1639_v57, %v4117_v37  ;;  %v1824_v59 = vpop.permute.xlu0 %1823  ;;  %v1827_v57 = vpop.permute.xlu1 %1826 }
 0x6cf   : > { %vm1829_vm14 = vcmp.eq.s32.totalorder %v1827_v57, 1 }
 0x6d0   : > { %v1656_v20 = vsel %vm1654_vm13, %v1640_v63, 0.0  ;;  %v4179_v62 = vsel %vm1654_vm13, %v1640_v63, %v4120_v38 }
 0x6d1   : > { %v2499_v26 = vpack.c.bf16 %v1656_v20, %v1655_v16  ;;  %v1687_v4 = vpack.c.bf16 %v4179_v62, %v4176_v23 }
 0x6d3   : > { %1721 = vmatmul.mubr.bf16.vlgmr.msra.gmra.mrb[24].mxu0 %v1687_v4  ;;  %2500 = vst [vmem:[%s1667_s26] sm:$0xff] %v2499_v26   ;;  %2720 = vmatmul.mubr.bf16.vlgmr.msra.gmra.mrb[24].mxu1 %v1687_v4  ;;  %s3145_s26 = scalar_lea.vmem %s4263_s2, 256 }
 0x6d4   : > { %1863 = vmatpush1.bf16.msra.mxu0 %v3941_v49  ;;  %2724 = vmatpush3.bf16.msra.mxu1 %v4013_v15  ;;  %v1679_v49 = vld [vmem:[%s4218_s14 + $0xc] sm:$0xff]  ;;  %p3146_p7 = scmp.ne.s32.totalorder %s4263_s2, %s3145_s26 }
 0x6d5   : > { %1864 = vmatprep.subr.bf16.mxu0 %v3946_v51  ;;  %2725 = vmatprep.subr.bf16.mxu1 %v3273_v0 }
 0x6d6   : > { %1894 = vmatprep.mubr.bf16.mxu0 %v3274_v1  ;;  %2739 = vmatprep.mubr.msk.bf16.mxu1 %vm3275_vm0, %v3273_v0  ;;  %v1677_v1 = vld [vmem:[%s4218_s14] sm:$0xff]  ;;  %vm1828_vm0 = vcmp.eq.s32.totalorder %v1824_v59, 1  ;;  %p3147_p1 = pnand %p3146_p7, %p4380_p12  ;;  %s3149_s14 = sshll.u32 %s3276_s30, 4  ;;  %s3150_s14 = int_to_ptr.vmem [resolvable:$false] %s3149_s14 }
 0x6d7   : > { %v1681_v51 = vunpack.c.l.bf16 %v1677_v1  ;;  %s3151_s17 = scalar_lea.vmem %s3150_s14, 512  ;;  %p3152_p9 = scmp.lt.s32.totalorder %s4263_s2, %s3150_s14 }
 0x6d8   : > { %1865 = vmatpush1.bf16.msra.mxu0 %v3954_v19  ;;  %2726 = vmatpush3.bf16.msra.mxu1 %v4023_v31  ;;  %v1684_v19 = vunpack.c.l.bf16 %v1679_v49  ;;  %v1682_v31 = vunpack.c.h.bf16 %v1677_v1  ;;  %v1851_v1 = vld [vmem:[%s4239_s28] sm:$0xff]  ;;  %p3148_p8 = pneg %p3147_p1  ;;  %p3153_p10 = scmp.lt.s32.totalorder %s3151_s17, %s3145_s26 }
 0x6d9   : > { %1866 = vmatprep.subr.bf16.mxu0 %v3959_v22  ;;  %2727 = vmatprep.subr.bf16.mxu1 %v3273_v0 }
 0x6da   : > { %p3154_p13 = por %p3153_p10, %p3152_p9 }
 0x6dc   : > { %1867 = vmatpush1.bf16.msra.mxu0 %v4029_v45  ;;  %2728 = vmatpush3.bf16.msra.mxu1 %v4033_v17  ;;  %p3155_p5 = pnand %p3154_p13, %p3148_p8 }
 0x6dd   : > { %1868 = vmatprep.subr.bf16.mxu0 %v4037_v18  ;;  %2729 = vmatprep.subr.bf16.mxu1 %v3273_v0 }
 0x6e0   : > { %1869 = vmatpush1.bf16.msra.mxu0 %v4042_v21  ;;  %2730 = vmatpush3.bf16.msra.mxu1 %v4046_v24  ;;  %v1685_v24 = vunpack.c.h.bf16 %v1679_v49  ;;  %v1853_v49 = vld [vmem:[%s4239_s28 + $0xc] sm:$0xff] }
 0x6e1   : > { %1870 = vmatprep.subr.bf16.mxu0 %v4050_v25  ;;  %2731 = vmatprep.subr.bf16.mxu1 %v3273_v0 }
 0x6e4   : > { %1871 = vmatpush1.bf16.msra.mxu0 %v4055_v27  ;;  %2732 = vmatpush3.bf16.msra.mxu1 %v4059_v29 }
 0x6e5   : > { %1872 = vmatprep.subr.bf16.mxu0 %v4063_v32  ;;  %2733 = vmatprep.subr.bf16.mxu1 %v3273_v0 }
 0x6e8   : > { %1873 = vmatpush1.bf16.msra.mxu0 %v4068_v36  ;;  %2734 = vmatpush3.bf16.msra.mxu1 %v4072_v39 }
 0x6e9   : > { %1874 = vmatprep.subr.bf16.mxu0 %v4076_v52  ;;  %2735 = vmatprep.subr.bf16.mxu1 %v3273_v0 }
 0x6ec   : > { %1875 = vmatpush1.bf16.msra.mxu0 %v4081_v53  ;;  %2736 = vmatpush3.bf16.msra.mxu1 %v4085_v50 }
 0x6ed   : > { %1876 = vmatprep.subr.bf16.mxu0 %v4089_v54  ;;  %2737 = vmatprep.subr.bf16.mxu1 %v3273_v0 }
 0x6f0   : > { %1877 = vmatpush1.bf16.msra.mxu0 %v4094_v55  ;;  %2738 = vmatpush3.bf16.msra.mxu1 %v4098_v56 }
 0x7a6   : > { %v1722_v22 = vpop.f32.mrb[24].mxu0  ;;  %v1765_v15 = vpop.f32.mrb[24].mxu1 }
 0x7a7   : > { %v1772_v45 = vadd.f32 %v1722_v22, %v1681_v51  ;;  %v1724_v17 = vpop.f32.mrb[25].mxu0  ;;  %v2721_v18 = vpop.f32.mrb[25].mxu1  ;;  %v1800_v41 = vadd.f32 %v4167_v28, %v1765_v15  ;;  %v1855_v51 = vunpack.c.l.bf16 %v1851_v1 }
 0x7a8   : > { %v1726_v0 = vpop.f32.mrb[26].mxu0  ;;  %v1768_v21 = vpop.f32.mrb[26].mxu1  ;;  %v1786_v36 = vadd.f32 %v1724_v17, %v1682_v31 }
 0x7a9   : > { %v2409_v25 = vmul.f32 -1.442695, %v1772_v45  ;;  %v1773_v27 = vadd.f32 %v1726_v0, %v1684_v19  ;;  %v1728_v29 = vpop.f32.mrb[27].mxu0  ;;  %v2722_v32 = vpop.f32.mrb[27].mxu1  ;;  %v1801_v2 = vadd.f32 %v4167_v28, %v1768_v21  ;;  %v1859_v0 = vunpack.c.h.bf16 %v1853_v49 }
 0x7aa   : > { %v1787_v52 = vadd.f32 %v1728_v29, %v1685_v24  ;;  %v2411_v53 = vmul.f32 -1.442695, %v1786_v36 }
 0x7ab   : > { %2990 = vpow2.f32 %v2409_v25  ;;  %v2410_v39 = vmul.f32 -1.442695, %v1773_v27 }
 0x7ac   : > { %v2412_v50 = vmul.f32 -1.442695, %v1787_v52 }
 0x7ad   : > { %2992 = vpow2.f32 %v2410_v39 }
 0x7ae   : > { %2994 = vpow2.f32 %v2411_v53 }
 0x7af   : > { %2996 = vpow2.f32 %v2412_v50 }
 0x7b5   : > { %v2991_v54 = vpop.eup %2990 }
 0x7b6   : > { %v1780_v55 = vadd.f32 1.0, %v2991_v54 }
 0x7b7   : > { %v2993_v56 = vpop.eup %2992 }
 0x7b8   : > { %2998 = vrcp.f32 %v1780_v55  ;;  %v1781_v37 = vadd.f32 1.0, %v2993_v56  ;;  %v2995_v38 = vpop.eup %2994 }
 0x7b9   : > { %v2997_v5 = vpop.eup %2996  ;;  %v1794_v46 = vadd.f32 1.0, %v2995_v38  ;;  %v1852_v38 = vld [vmem:[%s4239_s28 + $0x8] ss:$12 sps:$4 sm:$0xff]  }
 0x7ba   : > { %3000 = vrcp.f32 %v1781_v37  ;;  %v1795_v42 = vadd.f32 1.0, %v2997_v5  ;;  %v1857_v6 = vunpack.c.l.bf16 %v1852_v38 }
 0x7bb   : > { %3002 = vrcp.f32 %v1794_v46 }
 0x7bc   : > { %3004 = vrcp.f32 %v1795_v42 }
 0x7c2   : > { %v2999_v33 = vpop.eup %2998 }
 0x7c3   : > { %v1802_v34 = vmul.f32 %v2999_v33, %v1800_v41  ;;  %v1860_v33 = vunpack.c.h.bf16 %v1852_v38 }
 0x7c4   : > { %v3001_v40 = vpop.eup %3000 }
 0x7c5   : > { %v1804_v11 = vadd.f32 %v1802_v34, %v1683_v3  ;;  %v1803_v12 = vmul.f32 %v3001_v40, %v1801_v2  ;;  %v3003_v44 = vpop.eup %3002 }
 0x7c6   : > { %v3005_v30 = vpop.eup %3004  ;;  %v1808_v48 = vsub.f32 1.0, %v3003_v44  ;;  %v1812_v9 = vmul.f32 %v3003_v44, %v4176_v23 }
 0x7c7   : > { %3006 = vtanh.f32 %v1804_v11  ;;  %v1805_v43 = vadd.f32 %v1803_v12, %v1686_v35  ;;  %v1809_v47 = vsub.f32 1.0, %v3005_v30  ;;  %v1813_v7 = vmul.f32 %v3005_v30, %v4179_v62 }
 0x7c9   : > { %3008 = vtanh.f32 %v1805_v43 }
 0x7d1   : > { %v3007_v8 = vpop.eup %3006 }
 0x7d2   : > { %v1810_v10 = vmul.f32 %v3007_v8, %v1808_v48  ;;  %v1998_v48 = vpop.permute.xlu0 %1997 }
 0x7d3   : > { %v3009_v13 = vpop.eup %3008  ;;  %vm2002_vm15 = vcmp.eq.s32.totalorder %v1998_v48, 1 }
 0x7d4   : > { %v1811_v58 = vmul.f32 %v3009_v13, %v1809_v47  ;;  %v1814_v14 = vadd.f32 %v1812_v9, %v1810_v10  ;;  %v2001_v10 = vpop.permute.xlu1 %2000 }
 0x7d5   : > { %vm2003_vm1 = vcmp.eq.s32.totalorder %v2001_v10, 1 }
 0x7d6   : > { %v1815_v60 = vadd.f32 %v1813_v7, %v1811_v58  ;;  %v1830_v61 = vsel %vm1828_vm0, %v1814_v14, 0.0  ;;  %v4230_v16 = vsel %vm1828_vm0, %v1814_v14, %v4176_v23  ;;  %v1858_v23 = vunpack.c.l.bf16 %v1853_v49 }
 0x7d8   : > { %v1831_v63 = vsel %vm1829_vm14, %v1815_v60, 0.0  ;;  %v4233_v20 = vsel %vm1829_vm14, %v1815_v60, %v4179_v62  ;;  %v1856_v62 = vunpack.c.h.bf16 %v1851_v1 }
 0x7d9   : > { %v2504_v26 = vpack.c.bf16 %v1831_v63, %v1830_v61  ;;  %v1861_v4 = vpack.c.bf16 %v4233_v20, %v4230_v16 }
 0x7db   : > { %1895 = vmatmul.mubr.bf16.vlgmr.msra.gmra.mrb[28].mxu0 %v1861_v4  ;;  %2505 = vst [vmem:[%s1842_s20] sm:$0xff] %v2504_v26   ;;  %2740 = vmatmul.mubr.bf16.vlgmr.msra.gmra.mrb[28].mxu1 %v1861_v4 }
 0x8ae   : > { %v1896_v19 = vpop.f32.mrb[28].mxu0  ;;  %v1939_v22 = vpop.f32.mrb[28].mxu1 }
 0x8af   : > { %v1946_v15 = vadd.f32 %v1896_v19, %v1855_v51  ;;  %v1898_v31 = vpop.f32.mrb[29].mxu0  ;;  %v2741_v45 = vpop.f32.mrb[29].mxu1  ;;  %v1974_v46 = vadd.f32 %v4167_v28, %v1939_v22 }
 0x8b0   : > { %v1900_v17 = vpop.f32.mrb[30].mxu0  ;;  %v1942_v18 = vpop.f32.mrb[30].mxu1  ;;  %v1960_v29 = vadd.f32 %v1898_v31, %v1856_v62 }
 0x8b1   : > { %v2419_v21 = vmul.f32 -1.442695, %v1946_v15  ;;  %v1947_v24 = vadd.f32 %v1900_v17, %v1858_v23  ;;  %v1902_v25 = vpop.f32.mrb[31].mxu0  ;;  %v2742_v27 = vpop.f32.mrb[31].mxu1  ;;  %v1975_v34 = vadd.f32 %v4167_v28, %v1942_v18 }
 0x8b2   : > { %v1961_v36 = vadd.f32 %v1902_v25, %v1859_v0  ;;  %v2421_v39 = vmul.f32 -1.442695, %v1960_v29 }
 0x8b3   : > { %3010 = vpow2.f32 %v2419_v21  ;;  %v2420_v32 = vmul.f32 -1.442695, %v1947_v24 }
 0x8b4   : > { %v2422_v52 = vmul.f32 -1.442695, %v1961_v36 }
 0x8b5   : > { %3012 = vpow2.f32 %v2420_v32 }
 0x8b6   : > { %3014 = vpow2.f32 %v2421_v39 }
 0x8b7   : > { %3016 = vpow2.f32 %v2422_v52 }
 0x8bd   : > { %v3011_v53 = vpop.eup %3010 }
 0x8be   : > { %v1954_v50 = vadd.f32 1.0, %v3011_v53 }
 0x8bf   : > { %v3013_v54 = vpop.eup %3012 }
 0x8c0   : > { %3018 = vrcp.f32 %v1954_v50  ;;  %v1955_v55 = vadd.f32 1.0, %v3013_v54  ;;  %v3015_v56 = vpop.eup %3014 }
 0x8c1   : > { %v3017_v37 = vpop.eup %3016  ;;  %v1968_v5 = vadd.f32 1.0, %v3015_v56 }
 0x8c2   : > { %3020 = vrcp.f32 %v1955_v55  ;;  %v1969_v3 = vadd.f32 1.0, %v3017_v37 }
 0x8c3   : > { %3022 = vrcp.f32 %v1968_v5 }
 0x8c4   : > { %3024 = vrcp.f32 %v1969_v3 }
 0x8ca   : > { %v3019_v41 = vpop.eup %3018 }
 0x8cb   : > { %v1976_v42 = vmul.f32 %v3019_v41, %v1974_v46 }
 0x8cc   : > { %v3021_v35 = vpop.eup %3020 }
 0x8cd   : > { %v1978_v2 = vadd.f32 %v1976_v42, %v1857_v6  ;;  %v1977_v40 = vmul.f32 %v3021_v35, %v1975_v34  ;;  %v3023_v12 = vpop.eup %3022 }
 0x8ce   : > { %v3025_v43 = vpop.eup %3024  ;;  %v1982_v44 = vsub.f32 1.0, %v3023_v12  ;;  %v1986_v8 = vmul.f32 %v3023_v12, %v4230_v16 }
 0x8cf   : > { %3026 = vtanh.f32 %v1978_v2  ;;  %v1979_v11 = vadd.f32 %v1977_v40, %v1860_v33  ;;  %v1983_v9 = vsub.f32 1.0, %v3025_v43  ;;  %v1987_v58 = vmul.f32 %v3025_v43, %v4233_v20 }
 0x8d1   : > { %3028 = vtanh.f32 %v1979_v11 }
 0x8d9   : > { %v3027_v30 = vpop.eup %3026 }
 0x8da   : > { %v1984_v28 = vmul.f32 %v3027_v30, %v1982_v44 }
 0x8db   : > { %v3029_v47 = vpop.eup %3028 }
 0x8dc   : > { %v1988_v13 = vadd.f32 %v1986_v8, %v1984_v28  ;;  %v1985_v7 = vmul.f32 %v3029_v47, %v1983_v9 }
 0x8de   : > { %v1989_v14 = vadd.f32 %v1987_v58, %v1985_v7  ;;  %v2019_v59 = vsel %vm2002_vm15, %v1988_v13, %v4230_v16  ;;  %v2004_v57 = vsel %vm2002_vm15, %v1988_v13, 0.0 }
 0x8df   : > { %2023 = vst [vmem:[%s412_s15] sm:$0xff] %v2019_v59 }
 0x8e0   : > { %v2005_v60 = vsel %vm2003_vm1, %v1989_v14, 0.0  ;;  %v2020_v61 = vsel %vm2003_vm1, %v1989_v14, %v4233_v20 }
 0x8e1   : > { %v2509_v63 = vpack.c.bf16 %v2005_v60, %v2004_v57  ;;  %2024 = vst [vmem:[%s412_s15 + $0x8] sm:$0xff] %v2020_v61 }
 0x8e2   : > { %3158 = shalt.err (!%p3155_p5)
}
 0x8e3   : > { %s3159_s20 = scalar_lea.hbm %s4261_s8, 256  ;;  %s3163_s23 = scalar_lea.hbm %s4351_s6, 512 }
 0x8e4   : > { %p3160_p11 = scmp.ne.s32.totalorder %s4261_s8, %s3159_s20  ;;  %p3164_p3 = scmp.lt.u32.totalorder %s4261_s8, %s4351_s6 }
 0x8e5   : > { %p3165_p2 = scmp.lt.u32.totalorder %s3163_s23, %s3159_s20  ;;  %p3167_p7 = scmp.lt.u32.totalorder %s3159_s20, %s4261_s8 }
 0x8e6   : > { %p3161_p4 = pnand %p3160_p11, %p4380_p12 }
 0x8e7   : > { %p3166_p0 = por %p3165_p2, %p3164_p3 }
 0x8e8   : > { %p3162_p6 = pneg %p3161_p4 }
 0x8e9   : > { %p3168_p1 = por %p3167_p7, %p3166_p0 }
 0x8eb   : > { %p3169_p8 = pnand %p3168_p1, %p3162_p6 }
 0x8ed   : > { %3172 = shalt.err (!%p3169_p8)
}
 0x8ee   : > { %s3277_s9 = smov 128   ;;  %s3278_s12 = smov 8   ;;  %2510 = vst [vmem:[%s4248_s18] sm:$0xff] %v2509_v63  }
 0x8ef   : > { %2754 = dma.vmem_to_hbm [thread:$0]  (%p4380_p12), %s4263_s2, 256, %s4261_s8, %s2031_s7, %s3277_s9, %s3277_s9, %s3278_s12  }
 0x8f0   : > { %s2026_s1 = scalar_lea.sflag [#allocation5], %s3517_s29  ;;  %s3173_s24 = scalar_lea.vmem %s4270_s27, 1024 }
 0x8f1   : > { %p3174_p9 = scmp.ne.s32.totalorder %s4270_s27, %s3173_s24  ;;  %s3279_s16 = smov [#allocation9]  }
 0x8f2   : > { %s3177_s26 = sshll.u32 %s3279_s16, 4  ;;  %s3178_s26 = int_to_ptr.vmem [resolvable:$false] %s3177_s26 }
 0x8f3   : > { %p3175_p10 = pnand %p3174_p9, %p4380_p12  ;;  %s3179_s30 = scalar_lea.vmem %s3178_s26, 2048 }
 0x8f4   : > { %p3180_p5 = scmp.lt.s32.totalorder %s4270_s27, %s3178_s26  ;;  %p3181_p11 = scmp.lt.s32.totalorder %s3179_s30, %s3173_s24 }
 0x8f5   : > { %p3176_p13 = pneg %p3175_p10 }
 0x8f6   : > { %p3182_p4 = por %p3181_p11, %p3180_p5 }
 0x8f8   : > { %p3183_p6 = pnand %p3182_p4, %p3176_p13 }
 0x8fa   : > { %3186 = shalt.err (!%p3183_p6)
}
 0x8fb   : > { %s3187_s18 = scalar_lea.hbm %s4268_s13, 1024  ;;  %s3191_s7 = scalar_lea.hbm %s4350_s5, 2048 }
 0x8fc   : > { %p3188_p3 = scmp.ne.s32.totalorder %s4268_s13, %s3187_s18  ;;  %p3192_p7 = scmp.lt.u32.totalorder %s4268_s13, %s4350_s5 }
 0x8fd   : > { %p3193_p1 = scmp.lt.u32.totalorder %s3191_s7, %s3187_s18  ;;  %p3195_p9 = scmp.lt.u32.totalorder %s3187_s18, %s4268_s13 }
 0x8fe   : > { %p3189_p2 = pnand %p3188_p3, %p4380_p12 }
 0x8ff   : > { %p3194_p8 = por %p3193_p1, %p3192_p7 }
 0x900   : > { %p3190_p0 = pneg %p3189_p2 }
 0x901   : > { %p3196_p10 = por %p3195_p9, %p3194_p8 }
 0x903   : > { %p3197_p13 = pnand %p3196_p10, %p3190_p0 }
 0x905   : > { %3200 = shalt.err (!%p3197_p13)
}
 0x906   : > { %s3280_s20 = smov 64   ;;  %s3281_s11 = smov 4  }
 0x907   : > { %2753 = dma.vmem_to_hbm [thread:$0]  (%p4380_p12), %s4270_s27, 1024, %s4268_s13, %s2026_s1, %s3280_s20, %s3280_s20, %s3281_s11  }
 0x908 PF: > { %s4381_s28 = sld [smem:[#allocation20_spill]]  ;;  %s4382_s23 = sld [smem:[#allocation17_spill]] }
 0x909   : > { %s2083_s19 = sand.u32 1, %s3243_s21  }
 0x90a   : > { %s2084_s15 = scalar_lea.sflag [#allocation5], %s2083_s19 }
 0x90e   : > { %p4383_p5 = scmp.ne.s32.totalorder %s4381_s28, 0  ;;  %p4384_p11 = scmp.ge.s32.totalorder %s4382_s23, 2 }
 0x910   : > { %p2768_p4 = pnand %p4384_p11, %p4383_p5 }
 0x912   : > { %3234 = dma.done.wait (!%p2768_p4), %s2084_s15, 1024  }
 0x913   : > { %3236 = vsyncadd (!%p2768_p4), %s2084_s15, 4294966272  ;;  %s2093_s9 = scalar_lea.sflag [#allocation11], %s2083_s19 }
 0x914   : > { %3238 = dma.done.wait (!%p2768_p4), %s2093_s9, 256  }
 0x915   : > { %3240 = vsyncadd (!%p2768_p4), %s2093_s9, 4294967040  ;;  %s29_s26 = sadd.s32 1, %s4382_s23   ;;  %s4385_s10 = sld [smem:[#allocation16_spill]] }
 0x916   : > { %p26_p6 = scmp.ge.s32.totalorder %s29_s26, 4   ;;  %s4386_s23 = sld [smem:[#allocation19_spill]] }
 0x917   : > { %s4387_s29 = sld [smem:[#allocation18_spill]]  ;;  %s4388_s21 = smov %s3247_s22 }
 0x918   : > { %s4390_s24 = smov %s3259_s25  ;;  %28 = sbr.rel (!%p26_p6) target bundleno = 13 (0xd), region = 151 }
 0x91b   : > { %s4389_s22 = smov %s4385_s10 }
 0x91d   : > { %s4391_s25 = smov %s4387_s29 }
 0x91f   :  { %2098 = vsyncpa [#allocation4], 1 }
 0x920   :  { %2100 = vsyncpa [#allocation4 + $0x1], 1 }
 0x921   :  { %2101 = vsyncpa [#allocation7], 1 }
 0x922   :  { %2103 = vsyncpa [#allocation7 + $0x1], 1 }
 0x923   :  { %2104 = vsyncpa [#allocation5], 1 }
 0x924   :  { %2106 = vsyncpa [#allocation5 + $0x1], 1 }
 0x925   :  { %2107 = vsyncpa [#allocation11], 1 }
 0x926   :  { %2109 = vsyncpa [#allocation11 + $0x1], 1 }

</bundles_post_ra>
